<compile_context>
chip_gen: v6e
topology: v6e:2x2x1
jax: 0.10.0
libtpu: 0.0.40
codegen_flags: <defaults>
</compile_context>

<pallas_src>
import math
from functools import partial

import jax
import jax.numpy as jnp
import numpy as np
from jax import lax
from jax.experimental import pallas as pl
from jax.experimental.pallas import tpu as pltpu


def _flash_mha_kernel(q_ref, k_ref, v_ref,
                      wqt_ref, wkt_ref, wvt_ref, wot_ref,
                      bq_ref, bk_ref, bv_ref, bo_ref,
                      o_ref,
                      qp_scr, m_scr, l_scr, acc_scr,
                      *, num_heads, scale):
    ki = pl.program_id(2)
    nk = pl.num_programs(2)

    E = qp_scr.shape[-1]
    Dh = E // num_heads

    @pl.when(ki == 0)
    def _init():
        # Q projection once per (batch, q-tile). Weights are pre-transposed in
        # the wrapper, so this is a plain (TQ,E)@(E,E) MXU matmul (no vxpose).
        qp = (jnp.dot(q_ref[0], wqt_ref[...], preferred_element_type=jnp.float32)
              + bq_ref[...])
        qp_scr[...] = qp * scale
        m_scr[...] = jnp.full(m_scr.shape, -jnp.inf, dtype=jnp.float32)
        l_scr[...] = jnp.zeros(l_scr.shape, dtype=jnp.float32)
        acc_scr[...] = jnp.zeros(acc_scr.shape, dtype=jnp.float32)

    # K/V projection for the current key tile (single K=E matmuls, no transpose).
    # NOTE: recomputed per q-tile; for very long Lq hoist to a pre-pass.
    kp = (jnp.dot(k_ref[0], wkt_ref[...], preferred_element_type=jnp.float32)
          + bk_ref[...])
    vp = (jnp.dot(v_ref[0], wvt_ref[...], preferred_element_type=jnp.float32)
          + bv_ref[...])

    # Flash-style online-softmax update, per head.
    # TODO(synk): attn_mask / key_padding_mask / dropout not plumbed through.
    for h in range(num_heads):  # static unroll; fine for small num_heads
        lo = h * Dh
        qh = qp_scr[:, lo:lo + Dh]        # (TQ, Dh), already scaled by 1/sqrt(Dh)
        kh = kp[:, lo:lo + Dh]            # (TK, Dh)
        vh = vp[:, lo:lo + Dh]            # (TK, Dh)

        # scores: contract Dh of both operands -> no kh.T materialization.
        s = lax.dot_general(qh, kh,
                            dimension_numbers=(((1,), (1,)), ((), ())),
                            preferred_element_type=jnp.float32)     # (TQ, TK)

        m_prev = m_scr[:, h:h + 1]                                   # (TQ, 1)
        m_new = jnp.maximum(m_prev, jnp.max(s, axis=-1, keepdims=True))
        alpha = jnp.exp(m_prev - m_new)
        p = jnp.exp(s - m_new)                                       # (TQ, TK)

        l_scr[:, h:h + 1] = (alpha * l_scr[:, h:h + 1]
                             + jnp.sum(p, axis=-1, keepdims=True))
        acc_scr[:, lo:lo + Dh] = (alpha * acc_scr[:, lo:lo + Dh]
                                  + jnp.dot(p, vh,
                                            preferred_element_type=jnp.float32))
        m_scr[:, h:h + 1] = m_new

    @pl.when(ki == nk - 1)
    def _finalize():
        # Per-head softmax normalization: approx reciprocal on the EUP + one
        # Newton-Raphson step (f32-accurate, cheap (TQ, H) elementwise work).
        l = l_scr[...]                                               # (TQ, H)
        inv = pl.reciprocal(l, approx=True)
        inv = inv * (2.0 - l * inv)
        for h in range(num_heads):
            lo = h * Dh
            acc_scr[:, lo:lo + Dh] = acc_scr[:, lo:lo + Dh] * inv[:, h:h + 1]

        # Single lane-dense output projection: one (TQ,E)@(E,E) matmul instead
        # of H small-K matmuls through slices of Wo.
        out = (jnp.dot(acc_scr[...], wot_ref[...],
                       preferred_element_type=jnp.float32) + bo_ref[...])
        o_ref[0] = out.astype(o_ref.dtype)


def _pick_tile(n, preferred=(512, 256, 128)):
    """Largest preferred tile that divides n; fall back to the full extent."""
    for t in preferred:
        if n % t == 0:
            return t
    return n


def cross_attention_pallas(query, key, value, params, num_heads):
    B, Lq, E = query.shape
    _, Lk, _ = key.shape
    assert E % num_heads == 0, "embed_dim must be divisible by num_heads"
    Dh = E // num_heads

    # Pre-transpose torch-layout (out_features, in_features) weights ONCE so the
    # kernel computes x @ W^T as a plain matmul with no in-kernel transposes.
    wqt, wkt, wvt, wot = (params["wq"].T, params["wk"].T,
                          params["wv"].T, params["wo"].T)
    bq, bk, bv, bo = params["bq"], params["bk"], params["bv"], params["bo"]

    tq = _pick_tile(Lq)
    tk = _pick_tile(Lk)
    grid = (B, Lq // tq, Lk // tk)

    kernel = partial(_flash_mha_kernel, num_heads=num_heads,
                     scale=1.0 / math.sqrt(Dh))

    return pl.pallas_call(
        kernel,
        out_shape=jax.ShapeDtypeStruct((B, Lq, E), query.dtype),
        grid_spec=pltpu.PrefetchScalarGridSpec(
            num_scalar_prefetch=0,
            grid=grid,
            in_specs=[
                pl.BlockSpec((1, tq, E), lambda b, qi, ki: (b, qi, 0)),  # query
                pl.BlockSpec((1, tk, E), lambda b, qi, ki: (b, ki, 0)),  # key
                pl.BlockSpec((1, tk, E), lambda b, qi, ki: (b, ki, 0)),  # value
                pl.BlockSpec((E, E), lambda b, qi, ki: (0, 0)),          # Wq^T
                pl.BlockSpec((E, E), lambda b, qi, ki: (0, 0)),          # Wk^T
                pl.BlockSpec((E, E), lambda b, qi, ki: (0, 0)),          # Wv^T
                pl.BlockSpec((E, E), lambda b, qi, ki: (0, 0)),          # Wo^T
                pl.BlockSpec((1, E), lambda b, qi, ki: (0, 0)),          # bq
                pl.BlockSpec((1, E), lambda b, qi, ki: (0, 0)),          # bk
                pl.BlockSpec((1, E), lambda b, qi, ki: (0, 0)),          # bv
                pl.BlockSpec((1, E), lambda b, qi, ki: (0, 0)),          # bo
            ],
            out_specs=pl.BlockSpec((1, tq, E), lambda b, qi, ki: (b, qi, 0)),
            scratch_shapes=[
                pltpu.VMEM((tq, E), jnp.float32),          # scaled projected Q
                pltpu.VMEM((tq, num_heads), jnp.float32),  # running max m
                pltpu.VMEM((tq, num_heads), jnp.float32),  # running denom l
                pltpu.VMEM((tq, E), jnp.float32),          # unnormalized head outs
            ],
        ),
        compiler_params=pltpu.CompilerParams(
            dimension_semantics=("parallel", "parallel", "arbitrary"),
            vmem_limit_bytes=56 * 1024 * 1024,  # safe on v7x (64 MiB), roomy on v5e/v6e
        ),
    )(query, key, value, wqt, wkt, wvt, wot, bq, bk, bv, bo)


def cross_attention_reference(query, key, value, params, num_heads):
    """Pure-JAX reference reproducing nn.MultiheadAttention forward (no mask/dropout)."""
    B, Lq, E = query.shape
    _, Lk, _ = key.shape
    Dh = E // num_heads

    def proj(x, w, b):
        return jnp.einsum("ble,oe->blo", x, w) + b[0]

    qp = proj(query, params["wq"], params["bq"])
    kp = proj(key, params["wk"], params["bk"])
    vp = proj(value, params["wv"], params["bv"])

    qh = qp.reshape(B, Lq, num_heads, Dh).transpose(0, 2, 1, 3)
    kh = kp.reshape(B, Lk, num_heads, Dh).transpose(0, 2, 1, 3)
    vh = vp.reshape(B, Lk, num_heads, Dh).transpose(0, 2, 1, 3)

    s = jnp.einsum("bhqd,bhkd->bhqk", qh, kh) / math.sqrt(Dh)
    p = jax.nn.softmax(s, axis=-1)
    oh = jnp.einsum("bhqk,bhkd->bhqd", p, vh)
    o = oh.transpose(0, 2, 1, 3).reshape(B, Lq, E)
    return jnp.einsum("ble,oe->blo", o, params["wo"]) + params["bo"][0]


def init_params(key, embed_dim):
    """Synthetic init mimicking nn.MultiheadAttention shapes: in_proj split into
    Wq/Wk/Wv (E,E), out_proj.weight (E,E), biases (E,) stored as (1,E)."""
    E = embed_dim
    ks = jax.random.split(key, 8)
    bound = 1.0 / math.sqrt(E)
    u = lambda k, shape: jax.random.uniform(k, shape, jnp.float32, -bound, bound)
    return {
        "wq": u(ks[0], (E, E)),
        "wk": u(ks[1], (E, E)),
        "wv": u(ks[2], (E, E)),
        "wo": u(ks[3], (E, E)),
        "bq": u(ks[4], (1, E)),
        "bk": u(ks[5], (1, E)),
        "bv": u(ks[6], (1, E)),
        "bo": u(ks[7], (1, E)),
    }


if __name__ == "__main__":
    # E chosen as a multiple of 128 so the output last dim is lane-dense
    # (per the perf review); shapes kept small.
    B, Lq, Lk, E, H = 2, 8, 8, 128, 4

    root = jax.random.PRNGKey(0)
    kq, kk, kv, kp = jax.random.split(root, 4)
    query = jax.random.normal(kq, (B, Lq, E), jnp.float32)
    key = jax.random.normal(kk, (B, Lk, E), jnp.float32)
    value = jax.random.normal(kv, (B, Lk, E), jnp.float32)
    params = init_params(kp, E)

    out = cross_attention_pallas(query, key, value, params, H)
    out = jax.block_until_ready(out)

    ref = cross_attention_reference(query, key, value, params, H)
    np.testing.assert_allclose(np.asarray(out), np.asarray(ref),
                               rtol=1e-3, atol=1e-3)

    print("KERNEL_OK")
</pallas_src>

<mosaic_0001>
module attributes {stable_mosaic.version = 11 : i64} {
  func.func @_flash_mha_kernel(%arg0: i32, %arg1: i32, %arg2: i32, %arg3: memref<1x8x128xf32, #tpu.memory_space<vmem>>, %arg4: memref<1x8x128xf32, #tpu.memory_space<vmem>>, %arg5: memref<1x8x128xf32, #tpu.memory_space<vmem>>, %arg6: memref<128x128xf32, #tpu.memory_space<vmem>>, %arg7: memref<128x128xf32, #tpu.memory_space<vmem>>, %arg8: memref<128x128xf32, #tpu.memory_space<vmem>>, %arg9: memref<128x128xf32, #tpu.memory_space<vmem>>, %arg10: memref<1x128xf32, #tpu.memory_space<vmem>>, %arg11: memref<1x128xf32, #tpu.memory_space<vmem>>, %arg12: memref<1x128xf32, #tpu.memory_space<vmem>>, %arg13: memref<1x128xf32, #tpu.memory_space<vmem>>, %arg14: memref<1x8x128xf32, #tpu.memory_space<vmem>>, %arg15: memref<8x128xf32, #tpu.memory_space<vmem>>, %arg16: memref<8x4xf32, #tpu.memory_space<vmem>>, %arg17: memref<8x4xf32, #tpu.memory_space<vmem>>, %arg18: memref<8x128xf32, #tpu.memory_space<vmem>>) attributes {dimension_semantics = [#tpu.dimension_semantics<parallel>, #tpu.dimension_semantics<parallel>, #tpu.dimension_semantics<arbitrary>], iteration_bounds = array<i64: 2, 1, 1>, scalar_prefetch = 0 : i64, scratch_operands = 4 : i64, tpu.core_type = #tpu.core_type<tc>, window_params = [{transform_indices = @transform_0, window_bounds = array<i64: 1, 8, 128>}, {transform_indices = @transform_1, window_bounds = array<i64: 1, 8, 128>}, {transform_indices = @transform_2, window_bounds = array<i64: 1, 8, 128>}, {pipeline_mode = #tpu.pipeline_mode<synchronous>, transform_indices = @transform_3, window_bounds = array<i64: 128, 128>}, {pipeline_mode = #tpu.pipeline_mode<synchronous>, transform_indices = @transform_4, window_bounds = array<i64: 128, 128>}, {pipeline_mode = #tpu.pipeline_mode<synchronous>, transform_indices = @transform_5, window_bounds = array<i64: 128, 128>}, {pipeline_mode = #tpu.pipeline_mode<synchronous>, transform_indices = @transform_6, window_bounds = array<i64: 128, 128>}, {pipeline_mode = #tpu.pipeline_mode<synchronous>, transform_indices = @transform_7, window_bounds = array<i64: 1, 128>}, {pipeline_mode = #tpu.pipeline_mode<synchronous>, transform_indices = @transform_8, window_bounds = array<i64: 1, 128>}, {pipeline_mode = #tpu.pipeline_mode<synchronous>, transform_indices = @transform_9, window_bounds = array<i64: 1, 128>}, {pipeline_mode = #tpu.pipeline_mode<synchronous>, transform_indices = @transform_10, window_bounds = array<i64: 1, 128>}, {transform_indices = @transform_11, window_bounds = array<i64: 1, 8, 128>}]} {
    %c0_i32 = arith.constant 0 : i32
    %0 = arith.cmpi eq, %arg2, %c0_i32 : i32
    %1 = arith.extui %0 : i1 to i32
    %c0_i32_0 = arith.constant 0 : i32
    %2 = arith.cmpi ne, %1, %c0_i32_0 : i32
    scf.if %2 {
      %c0_83 = arith.constant 0 : index
      %c0_84 = arith.constant 0 : index
      %c0_85 = arith.constant 0 : index
      %124 = vector.load %arg3[%c0_83, %c0_84, %c0_85] : memref<1x8x128xf32, #tpu.memory_space<vmem>>, vector<1x8x128xf32>
      %125 = vector.shape_cast %124 : vector<1x8x128xf32> to vector<8x128xf32>
      %c0_86 = arith.constant 0 : index
      %c0_87 = arith.constant 0 : index
      %126 = vector.load %arg6[%c0_86, %c0_87] : memref<128x128xf32, #tpu.memory_space<vmem>>, vector<128x128xf32>
      %cst_88 = arith.constant dense<0.000000e+00> : vector<8x128xf32>
      %127 = tpu.matmul %125, %126, %cst_88 {dimension_numbers = #tpu.dot_dimension_numbers<[1], [0], [0], [1], [0, 0, 1, 1], [], []>} : vector<8x128xf32>, vector<128x128xf32>, vector<8x128xf32> -> vector<8x128xf32>
      %c0_89 = arith.constant 0 : index
      %c0_90 = arith.constant 0 : index
      %128 = vector.load %arg10[%c0_89, %c0_90] : memref<1x128xf32, #tpu.memory_space<vmem>>, vector<1x128xf32>
      %129 = vector.broadcast %128 : vector<1x128xf32> to vector<8x128xf32>
      %130 = arith.addf %127, %129 : vector<8x128xf32>
      %cst_91 = arith.constant 0.176776692 : f32
      %131 = vector.broadcast %cst_91 : f32 to vector<8x128xf32>
      %132 = arith.mulf %130, %131 : vector<8x128xf32>
      %c0_92 = arith.constant 0 : index
      %c0_93 = arith.constant 0 : index
      %133 = vector.load %arg15[%c0_92, %c0_93] : memref<8x128xf32, #tpu.memory_space<vmem>>, vector<8x128xf32>
      tpu.vector_store %arg15[%c0_92, %c0_93], %132 {strides = array<i32>} : memref<8x128xf32, #tpu.memory_space<vmem>>, vector<8x128xf32>,
      %cst_94 = arith.constant 0xFF800000 : f32
      %134 = vector.broadcast %cst_94 : f32 to vector<8x4xf32>
      %c0_95 = arith.constant 0 : index
      %c0_96 = arith.constant 0 : index
      %135 = vector.load %arg16[%c0_95, %c0_96] : memref<8x4xf32, #tpu.memory_space<vmem>>, vector<8x4xf32>
      tpu.vector_store %arg16[%c0_95, %c0_96], %134 {strides = array<i32>} : memref<8x4xf32, #tpu.memory_space<vmem>>, vector<8x4xf32>,
      %cst_97 = arith.constant 0.000000e+00 : f32
      %136 = vector.broadcast %cst_97 : f32 to vector<8x4xf32>
      %c0_98 = arith.constant 0 : index
      %c0_99 = arith.constant 0 : index
      %137 = vector.load %arg17[%c0_98, %c0_99] : memref<8x4xf32, #tpu.memory_space<vmem>>, vector<8x4xf32>
      tpu.vector_store %arg17[%c0_98, %c0_99], %136 {strides = array<i32>} : memref<8x4xf32, #tpu.memory_space<vmem>>, vector<8x4xf32>,
      %cst_100 = arith.constant 0.000000e+00 : f32
      %138 = vector.broadcast %cst_100 : f32 to vector<8x128xf32>
      %c0_101 = arith.constant 0 : index
      %c0_102 = arith.constant 0 : index
      %139 = vector.load %arg18[%c0_101, %c0_102] : memref<8x128xf32, #tpu.memory_space<vmem>>, vector<8x128xf32>
      tpu.vector_store %arg18[%c0_101, %c0_102], %138 {strides = array<i32>} : memref<8x128xf32, #tpu.memory_space<vmem>>, vector<8x128xf32>,
    } else {
    }
    %c0 = arith.constant 0 : index
    %c0_1 = arith.constant 0 : index
    %c0_2 = arith.constant 0 : index
    %3 = vector.load %arg4[%c0, %c0_1, %c0_2] : memref<1x8x128xf32, #tpu.memory_space<vmem>>, vector<1x8x128xf32>
    %4 = vector.shape_cast %3 : vector<1x8x128xf32> to vector<8x128xf32>
    %c0_3 = arith.constant 0 : index
    %c0_4 = arith.constant 0 : index
    %5 = vector.load %arg7[%c0_3, %c0_4] : memref<128x128xf32, #tpu.memory_space<vmem>>, vector<128x128xf32>
    %cst = arith.constant dense<0.000000e+00> : vector<8x128xf32>
    %6 = tpu.matmul %4, %5, %cst {dimension_numbers = #tpu.dot_dimension_numbers<[1], [0], [0], [1], [0, 0, 1, 1], [], []>} : vector<8x128xf32>, vector<128x128xf32>, vector<8x128xf32> -> vector<8x128xf32>
    %c0_5 = arith.constant 0 : index
    %c0_6 = arith.constant 0 : index
    %7 = vector.load %arg11[%c0_5, %c0_6] : memref<1x128xf32, #tpu.memory_space<vmem>>, vector<1x128xf32>
    %8 = vector.broadcast %7 : vector<1x128xf32> to vector<8x128xf32>
    %9 = arith.addf %6, %8 : vector<8x128xf32>
    %c0_7 = arith.constant 0 : index
    %c0_8 = arith.constant 0 : index
    %c0_9 = arith.constant 0 : index
    %10 = vector.load %arg5[%c0_7, %c0_8, %c0_9] : memref<1x8x128xf32, #tpu.memory_space<vmem>>, vector<1x8x128xf32>
    %11 = vector.shape_cast %10 : vector<1x8x128xf32> to vector<8x128xf32>
    %c0_10 = arith.constant 0 : index
    %c0_11 = arith.constant 0 : index
    %12 = vector.load %arg8[%c0_10, %c0_11] : memref<128x128xf32, #tpu.memory_space<vmem>>, vector<128x128xf32>
    %cst_12 = arith.constant dense<0.000000e+00> : vector<8x128xf32>
    %13 = tpu.matmul %11, %12, %cst_12 {dimension_numbers = #tpu.dot_dimension_numbers<[1], [0], [0], [1], [0, 0, 1, 1], [], []>} : vector<8x128xf32>, vector<128x128xf32>, vector<8x128xf32> -> vector<8x128xf32>
    %c0_13 = arith.constant 0 : index
    %c0_14 = arith.constant 0 : index
    %14 = vector.load %arg12[%c0_13, %c0_14] : memref<1x128xf32, #tpu.memory_space<vmem>>, vector<1x128xf32>
    %15 = vector.broadcast %14 : vector<1x128xf32> to vector<8x128xf32>
    %16 = arith.addf %13, %15 : vector<8x128xf32>
    %c0_15 = arith.constant 0 : index
    %c0_16 = arith.constant 0 : index
    %17 = vector.load %arg15[%c0_15, %c0_16] : memref<8x128xf32, #tpu.memory_space<vmem>>, vector<8x32xf32>
    %18 = vector.extract_strided_slice %9 {offsets = [0, 0], sizes = [8, 32], strides = [1, 1]} : vector<8x128xf32> to vector<8x32xf32>
    %19 = vector.extract_strided_slice %16 {offsets = [0, 0], sizes = [8, 32], strides = [1, 1]} : vector<8x128xf32> to vector<8x32xf32>
    %cst_17 = arith.constant dense<0.000000e+00> : vector<8x8xf32>
    %20 = tpu.matmul %17, %18, %cst_17 {dimension_numbers = #tpu.dot_dimension_numbers<[1], [1], [0], [0], [0, 0, 1, 0], [], []>} : vector<8x32xf32>, vector<8x32xf32>, vector<8x8xf32> -> vector<8x8xf32>
    %c0_18 = arith.constant 0 : index
    %c0_19 = arith.constant 0 : index
    %21 = vector.load %arg16[%c0_18, %c0_19] : memref<8x4xf32, #tpu.memory_space<vmem>>, vector<8x1xf32>
    %cst_20 = arith.constant dense<0xFF800000> : vector<8xf32>
    %22 = vector.multi_reduction <maximumf>, %20, %cst_20 [1] : vector<8x8xf32> to vector<8xf32>
    %23 = vector.shape_cast %22 : vector<8xf32> to vector<8x1xf32>
    %24 = arith.maximumf %21, %23 : vector<8x1xf32>
    %25 = arith.subf %21, %24 : vector<8x1xf32>
    %26 = math.exp %25 : vector<8x1xf32>
    %27 = vector.broadcast %24 : vector<8x1xf32> to vector<8x8xf32>
    %28 = arith.subf %20, %27 : vector<8x8xf32>
    %29 = math.exp %28 : vector<8x8xf32>
    %c0_21 = arith.constant 0 : index
    %c0_22 = arith.constant 0 : index
    %30 = vector.load %arg17[%c0_21, %c0_22] : memref<8x4xf32, #tpu.memory_space<vmem>>, vector<8x1xf32>
    %31 = arith.mulf %26, %30 : vector<8x1xf32>
    %cst_23 = arith.constant dense<0.000000e+00> : vector<8xf32>
    %32 = vector.multi_reduction <add>, %29, %cst_23 [1] : vector<8x8xf32> to vector<8xf32>
    %33 = vector.shape_cast %32 : vector<8xf32> to vector<8x1xf32>
    %34 = arith.addf %31, %33 : vector<8x1xf32>
    %c0_24 = arith.constant 0 : index
    %c0_25 = arith.constant 0 : index
    %35 = vector.load %arg17[%c0_24, %c0_25] : memref<8x4xf32, #tpu.memory_space<vmem>>, vector<8x1xf32>
    tpu.vector_store %arg17[%c0_24, %c0_25], %34 {strides = array<i32>} : memref<8x4xf32, #tpu.memory_space<vmem>>, vector<8x1xf32>,
    %c0_26 = arith.constant 0 : index
    %c0_27 = arith.constant 0 : index
    %36 = vector.load %arg18[%c0_26, %c0_27] : memref<8x128xf32, #tpu.memory_space<vmem>>, vector<8x32xf32>
    %37 = vector.broadcast %26 : vector<8x1xf32> to vector<8x32xf32>
    %38 = arith.mulf %37, %36 : vector<8x32xf32>
    %cst_28 = arith.constant dense<0.000000e+00> : vector<8x32xf32>
    %39 = tpu.matmul %29, %19, %cst_28 {dimension_numbers = #tpu.dot_dimension_numbers<[1], [0], [0], [1], [0, 0, 1, 1], [], []>} : vector<8x8xf32>, vector<8x32xf32>, vector<8x32xf32> -> vector<8x32xf32>
    %40 = arith.addf %38, %39 : vector<8x32xf32>
    %c0_29 = arith.constant 0 : index
    %c0_30 = arith.constant 0 : index
    %41 = vector.load %arg18[%c0_29, %c0_30] : memref<8x128xf32, #tpu.memory_space<vmem>>, vector<8x32xf32>
    tpu.vector_store %arg18[%c0_29, %c0_30], %40 {strides = array<i32>} : memref<8x128xf32, #tpu.memory_space<vmem>>, vector<8x32xf32>,
    %c0_31 = arith.constant 0 : index
    %c0_32 = arith.constant 0 : index
    %42 = vector.load %arg16[%c0_31, %c0_32] : memref<8x4xf32, #tpu.memory_space<vmem>>, vector<8x1xf32>
    tpu.vector_store %arg16[%c0_31, %c0_32], %24 {strides = array<i32>} : memref<8x4xf32, #tpu.memory_space<vmem>>, vector<8x1xf32>,
    %c0_33 = arith.constant 0 : index
    %c32 = arith.constant 32 : index
    %43 = vector.load %arg15[%c0_33, %c32] : memref<8x128xf32, #tpu.memory_space<vmem>>, vector<8x32xf32>
    %44 = vector.extract_strided_slice %9 {offsets = [0, 32], sizes = [8, 32], strides = [1, 1]} : vector<8x128xf32> to vector<8x32xf32>
    %45 = vector.extract_strided_slice %16 {offsets = [0, 32], sizes = [8, 32], strides = [1, 1]} : vector<8x128xf32> to vector<8x32xf32>
    %cst_34 = arith.constant dense<0.000000e+00> : vector<8x8xf32>
    %46 = tpu.matmul %43, %44, %cst_34 {dimension_numbers = #tpu.dot_dimension_numbers<[1], [1], [0], [0], [0, 0, 1, 0], [], []>} : vector<8x32xf32>, vector<8x32xf32>, vector<8x8xf32> -> vector<8x8xf32>
    %c0_35 = arith.constant 0 : index
    %c1 = arith.constant 1 : index
    %47 = vector.load %arg16[%c0_35, %c1] : memref<8x4xf32, #tpu.memory_space<vmem>>, vector<8x1xf32>
    %cst_36 = arith.constant dense<0xFF800000> : vector<8xf32>
    %48 = vector.multi_reduction <maximumf>, %46, %cst_36 [1] : vector<8x8xf32> to vector<8xf32>
    %49 = vector.shape_cast %48 : vector<8xf32> to vector<8x1xf32>
    %50 = arith.maximumf %47, %49 : vector<8x1xf32>
    %51 = arith.subf %47, %50 : vector<8x1xf32>
    %52 = math.exp %51 : vector<8x1xf32>
    %53 = vector.broadcast %50 : vector<8x1xf32> to vector<8x8xf32>
    %54 = arith.subf %46, %53 : vector<8x8xf32>
    %55 = math.exp %54 : vector<8x8xf32>
    %c0_37 = arith.constant 0 : index
    %c1_38 = arith.constant 1 : index
    %56 = vector.load %arg17[%c0_37, %c1_38] : memref<8x4xf32, #tpu.memory_space<vmem>>, vector<8x1xf32>
    %57 = arith.mulf %52, %56 : vector<8x1xf32>
    %cst_39 = arith.constant dense<0.000000e+00> : vector<8xf32>
    %58 = vector.multi_reduction <add>, %55, %cst_39 [1] : vector<8x8xf32> to vector<8xf32>
    %59 = vector.shape_cast %58 : vector<8xf32> to vector<8x1xf32>
    %60 = arith.addf %57, %59 : vector<8x1xf32>
    %c0_40 = arith.constant 0 : index
    %c1_41 = arith.constant 1 : index
    %61 = vector.load %arg17[%c0_40, %c1_41] : memref<8x4xf32, #tpu.memory_space<vmem>>, vector<8x1xf32>
    tpu.vector_store %arg17[%c0_40, %c1_41], %60 {strides = array<i32>} : memref<8x4xf32, #tpu.memory_space<vmem>>, vector<8x1xf32>,
    %c0_42 = arith.constant 0 : index
    %c32_43 = arith.constant 32 : index
    %62 = vector.load %arg18[%c0_42, %c32_43] : memref<8x128xf32, #tpu.memory_space<vmem>>, vector<8x32xf32>
    %63 = vector.broadcast %52 : vector<8x1xf32> to vector<8x32xf32>
    %64 = arith.mulf %63, %62 : vector<8x32xf32>
    %cst_44 = arith.constant dense<0.000000e+00> : vector<8x32xf32>
    %65 = tpu.matmul %55, %45, %cst_44 {dimension_numbers = #tpu.dot_dimension_numbers<[1], [0], [0], [1], [0, 0, 1, 1], [], []>} : vector<8x8xf32>, vector<8x32xf32>, vector<8x32xf32> -> vector<8x32xf32>
    %66 = arith.addf %64, %65 : vector<8x32xf32>
    %c0_45 = arith.constant 0 : index
    %c32_46 = arith.constant 32 : index
    %67 = vector.load %arg18[%c0_45, %c32_46] : memref<8x128xf32, #tpu.memory_space<vmem>>, vector<8x32xf32>
    tpu.vector_store %arg18[%c0_45, %c32_46], %66 {strides = array<i32>} : memref<8x128xf32, #tpu.memory_space<vmem>>, vector<8x32xf32>,
    %c0_47 = arith.constant 0 : index
    %c1_48 = arith.constant 1 : index
    %68 = vector.load %arg16[%c0_47, %c1_48] : memref<8x4xf32, #tpu.memory_space<vmem>>, vector<8x1xf32>
    tpu.vector_store %arg16[%c0_47, %c1_48], %50 {strides = array<i32>} : memref<8x4xf32, #tpu.memory_space<vmem>>, vector<8x1xf32>,
    %c0_49 = arith.constant 0 : index
    %c64 = arith.constant 64 : index
    %69 = vector.load %arg15[%c0_49, %c64] : memref<8x128xf32, #tpu.memory_space<vmem>>, vector<8x32xf32>
    %70 = vector.extract_strided_slice %9 {offsets = [0, 64], sizes = [8, 32], strides = [1, 1]} : vector<8x128xf32> to vector<8x32xf32>
    %71 = vector.extract_strided_slice %16 {offsets = [0, 64], sizes = [8, 32], strides = [1, 1]} : vector<8x128xf32> to vector<8x32xf32>
    %cst_50 = arith.constant dense<0.000000e+00> : vector<8x8xf32>
    %72 = tpu.matmul %69, %70, %cst_50 {dimension_numbers = #tpu.dot_dimension_numbers<[1], [1], [0], [0], [0, 0, 1, 0], [], []>} : vector<8x32xf32>, vector<8x32xf32>, vector<8x8xf32> -> vector<8x8xf32>
    %c0_51 = arith.constant 0 : index
    %c2 = arith.constant 2 : index
    %73 = vector.load %arg16[%c0_51, %c2] : memref<8x4xf32, #tpu.memory_space<vmem>>, vector<8x1xf32>
    %cst_52 = arith.constant dense<0xFF800000> : vector<8xf32>
    %74 = vector.multi_reduction <maximumf>, %72, %cst_52 [1] : vector<8x8xf32> to vector<8xf32>
    %75 = vector.shape_cast %74 : vector<8xf32> to vector<8x1xf32>
    %76 = arith.maximumf %73, %75 : vector<8x1xf32>
    %77 = arith.subf %73, %76 : vector<8x1xf32>
    %78 = math.exp %77 : vector<8x1xf32>
    %79 = vector.broadcast %76 : vector<8x1xf32> to vector<8x8xf32>
    %80 = arith.subf %72, %79 : vector<8x8xf32>
    %81 = math.exp %80 : vector<8x8xf32>
    %c0_53 = arith.constant 0 : index
    %c2_54 = arith.constant 2 : index
    %82 = vector.load %arg17[%c0_53, %c2_54] : memref<8x4xf32, #tpu.memory_space<vmem>>, vector<8x1xf32>
    %83 = arith.mulf %78, %82 : vector<8x1xf32>
    %cst_55 = arith.constant dense<0.000000e+00> : vector<8xf32>
    %84 = vector.multi_reduction <add>, %81, %cst_55 [1] : vector<8x8xf32> to vector<8xf32>
    %85 = vector.shape_cast %84 : vector<8xf32> to vector<8x1xf32>
    %86 = arith.addf %83, %85 : vector<8x1xf32>
    %c0_56 = arith.constant 0 : index
    %c2_57 = arith.constant 2 : index
    %87 = vector.load %arg17[%c0_56, %c2_57] : memref<8x4xf32, #tpu.memory_space<vmem>>, vector<8x1xf32>
    tpu.vector_store %arg17[%c0_56, %c2_57], %86 {strides = array<i32>} : memref<8x4xf32, #tpu.memory_space<vmem>>, vector<8x1xf32>,
    %c0_58 = arith.constant 0 : index
    %c64_59 = arith.constant 64 : index
    %88 = vector.load %arg18[%c0_58, %c64_59] : memref<8x128xf32, #tpu.memory_space<vmem>>, vector<8x32xf32>
    %89 = vector.broadcast %78 : vector<8x1xf32> to vector<8x32xf32>
    %90 = arith.mulf %89, %88 : vector<8x32xf32>
    %cst_60 = arith.constant dense<0.000000e+00> : vector<8x32xf32>
    %91 = tpu.matmul %81, %71, %cst_60 {dimension_numbers = #tpu.dot_dimension_numbers<[1], [0], [0], [1], [0, 0, 1, 1], [], []>} : vector<8x8xf32>, vector<8x32xf32>, vector<8x32xf32> -> vector<8x32xf32>
    %92 = arith.addf %90, %91 : vector<8x32xf32>
    %c0_61 = arith.constant 0 : index
    %c64_62 = arith.constant 64 : index
    %93 = vector.load %arg18[%c0_61, %c64_62] : memref<8x128xf32, #tpu.memory_space<vmem>>, vector<8x32xf32>
    tpu.vector_store %arg18[%c0_61, %c64_62], %92 {strides = array<i32>} : memref<8x128xf32, #tpu.memory_space<vmem>>, vector<8x32xf32>,
    %c0_63 = arith.constant 0 : index
    %c2_64 = arith.constant 2 : index
    %94 = vector.load %arg16[%c0_63, %c2_64] : memref<8x4xf32, #tpu.memory_space<vmem>>, vector<8x1xf32>
    tpu.vector_store %arg16[%c0_63, %c2_64], %76 {strides = array<i32>} : memref<8x4xf32, #tpu.memory_space<vmem>>, vector<8x1xf32>,
    %c0_65 = arith.constant 0 : index
    %c96 = arith.constant 96 : index
    %95 = vector.load %arg15[%c0_65, %c96] : memref<8x128xf32, #tpu.memory_space<vmem>>, vector<8x32xf32>
    %96 = vector.extract_strided_slice %9 {offsets = [0, 96], sizes = [8, 32], strides = [1, 1]} : vector<8x128xf32> to vector<8x32xf32>
    %97 = vector.extract_strided_slice %16 {offsets = [0, 96], sizes = [8, 32], strides = [1, 1]} : vector<8x128xf32> to vector<8x32xf32>
    %cst_66 = arith.constant dense<0.000000e+00> : vector<8x8xf32>
    %98 = tpu.matmul %95, %96, %cst_66 {dimension_numbers = #tpu.dot_dimension_numbers<[1], [1], [0], [0], [0, 0, 1, 0], [], []>} : vector<8x32xf32>, vector<8x32xf32>, vector<8x8xf32> -> vector<8x8xf32>
    %c0_67 = arith.constant 0 : index
    %c3 = arith.constant 3 : index
    %99 = vector.load %arg16[%c0_67, %c3] : memref<8x4xf32, #tpu.memory_space<vmem>>, vector<8x1xf32>
    %cst_68 = arith.constant dense<0xFF800000> : vector<8xf32>
    %100 = vector.multi_reduction <maximumf>, %98, %cst_68 [1] : vector<8x8xf32> to vector<8xf32>
    %101 = vector.shape_cast %100 : vector<8xf32> to vector<8x1xf32>
    %102 = arith.maximumf %99, %101 : vector<8x1xf32>
    %103 = arith.subf %99, %102 : vector<8x1xf32>
    %104 = math.exp %103 : vector<8x1xf32>
    %105 = vector.broadcast %102 : vector<8x1xf32> to vector<8x8xf32>
    %106 = arith.subf %98, %105 : vector<8x8xf32>
    %107 = math.exp %106 : vector<8x8xf32>
    %c0_69 = arith.constant 0 : index
    %c3_70 = arith.constant 3 : index
    %108 = vector.load %arg17[%c0_69, %c3_70] : memref<8x4xf32, #tpu.memory_space<vmem>>, vector<8x1xf32>
    %109 = arith.mulf %104, %108 : vector<8x1xf32>
    %cst_71 = arith.constant dense<0.000000e+00> : vector<8xf32>
    %110 = vector.multi_reduction <add>, %107, %cst_71 [1] : vector<8x8xf32> to vector<8xf32>
    %111 = vector.shape_cast %110 : vector<8xf32> to vector<8x1xf32>
    %112 = arith.addf %109, %111 : vector<8x1xf32>
    %c0_72 = arith.constant 0 : index
    %c3_73 = arith.constant 3 : index
    %113 = vector.load %arg17[%c0_72, %c3_73] : memref<8x4xf32, #tpu.memory_space<vmem>>, vector<8x1xf32>
    tpu.vector_store %arg17[%c0_72, %c3_73], %112 {strides = array<i32>} : memref<8x4xf32, #tpu.memory_space<vmem>>, vector<8x1xf32>,
    %c0_74 = arith.constant 0 : index
    %c96_75 = arith.constant 96 : index
    %114 = vector.load %arg18[%c0_74, %c96_75] : memref<8x128xf32, #tpu.memory_space<vmem>>, vector<8x32xf32>
    %115 = vector.broadcast %104 : vector<8x1xf32> to vector<8x32xf32>
    %116 = arith.mulf %115, %114 : vector<8x32xf32>
    %cst_76 = arith.constant dense<0.000000e+00> : vector<8x32xf32>
    %117 = tpu.matmul %107, %97, %cst_76 {dimension_numbers = #tpu.dot_dimension_numbers<[1], [0], [0], [1], [0, 0, 1, 1], [], []>} : vector<8x8xf32>, vector<8x32xf32>, vector<8x32xf32> -> vector<8x32xf32>
    %118 = arith.addf %116, %117 : vector<8x32xf32>
    %c0_77 = arith.constant 0 : index
    %c96_78 = arith.constant 96 : index
    %119 = vector.load %arg18[%c0_77, %c96_78] : memref<8x128xf32, #tpu.memory_space<vmem>>, vector<8x32xf32>
    tpu.vector_store %arg18[%c0_77, %c96_78], %118 {strides = array<i32>} : memref<8x128xf32, #tpu.memory_space<vmem>>, vector<8x32xf32>,
    %c0_79 = arith.constant 0 : index
    %c3_80 = arith.constant 3 : index
    %120 = vector.load %arg16[%c0_79, %c3_80] : memref<8x4xf32, #tpu.memory_space<vmem>>, vector<8x1xf32>
    tpu.vector_store %arg16[%c0_79, %c3_80], %102 {strides = array<i32>} : memref<8x4xf32, #tpu.memory_space<vmem>>, vector<8x1xf32>,
    %c0_i32_81 = arith.constant 0 : i32
    %121 = arith.cmpi eq, %arg2, %c0_i32_81 : i32
    %122 = arith.extui %121 : i1 to i32
    %c0_i32_82 = arith.constant 0 : i32
    %123 = arith.cmpi ne, %122, %c0_i32_82 : i32
    scf.if %123 {
      %c0_83 = arith.constant 0 : index
      %c0_84 = arith.constant 0 : index
      %124 = vector.load %arg17[%c0_83, %c0_84] : memref<8x4xf32, #tpu.memory_space<vmem>>, vector<8x4xf32>
      %125 = tpu.reciprocal %124 {approx = true} : vector<8x4xf32> -> vector<8x4xf32>
      %126 = arith.mulf %124, %125 : vector<8x4xf32>
      %cst_85 = arith.constant 2.000000e+00 : f32
      %127 = vector.broadcast %cst_85 : f32 to vector<8x4xf32>
      %128 = arith.subf %127, %126 : vector<8x4xf32>
      %129 = arith.mulf %125, %128 : vector<8x4xf32>
      %c0_86 = arith.constant 0 : index
      %c0_87 = arith.constant 0 : index
      %130 = vector.load %arg18[%c0_86, %c0_87] : memref<8x128xf32, #tpu.memory_space<vmem>>, vector<8x32xf32>
      %131 = vector.extract_strided_slice %129 {offsets = [0, 0], sizes = [8, 1], strides = [1, 1]} : vector<8x4xf32> to vector<8x1xf32>
      %132 = vector.broadcast %131 : vector<8x1xf32> to vector<8x32xf32>
      %133 = arith.mulf %130, %132 : vector<8x32xf32>
      %c0_88 = arith.constant 0 : index
      %c0_89 = arith.constant 0 : index
      %134 = vector.load %arg18[%c0_88, %c0_89] : memref<8x128xf32, #tpu.memory_space<vmem>>, vector<8x32xf32>
      tpu.vector_store %arg18[%c0_88, %c0_89], %133 {strides = array<i32>} : memref<8x128xf32, #tpu.memory_space<vmem>>, vector<8x32xf32>,
      %c0_90 = arith.constant 0 : index
      %c32_91 = arith.constant 32 : index
      %135 = vector.load %arg18[%c0_90, %c32_91] : memref<8x128xf32, #tpu.memory_space<vmem>>, vector<8x32xf32>
      %136 = vector.extract_strided_slice %129 {offsets = [0, 1], sizes = [8, 1], strides = [1, 1]} : vector<8x4xf32> to vector<8x1xf32>
      %137 = vector.broadcast %136 : vector<8x1xf32> to vector<8x32xf32>
      %138 = arith.mulf %135, %137 : vector<8x32xf32>
      %c0_92 = arith.constant 0 : index
      %c32_93 = arith.constant 32 : index
      %139 = vector.load %arg18[%c0_92, %c32_93] : memref<8x128xf32, #tpu.memory_space<vmem>>, vector<8x32xf32>
      tpu.vector_store %arg18[%c0_92, %c32_93], %138 {strides = array<i32>} : memref<8x128xf32, #tpu.memory_space<vmem>>, vector<8x32xf32>,
      %c0_94 = arith.constant 0 : index
      %c64_95 = arith.constant 64 : index
      %140 = vector.load %arg18[%c0_94, %c64_95] : memref<8x128xf32, #tpu.memory_space<vmem>>, vector<8x32xf32>
      %141 = vector.extract_strided_slice %129 {offsets = [0, 2], sizes = [8, 1], strides = [1, 1]} : vector<8x4xf32> to vector<8x1xf32>
      %142 = vector.broadcast %141 : vector<8x1xf32> to vector<8x32xf32>
      %143 = arith.mulf %140, %142 : vector<8x32xf32>
      %c0_96 = arith.constant 0 : index
      %c64_97 = arith.constant 64 : index
      %144 = vector.load %arg18[%c0_96, %c64_97] : memref<8x128xf32, #tpu.memory_space<vmem>>, vector<8x32xf32>
      tpu.vector_store %arg18[%c0_96, %c64_97], %143 {strides = array<i32>} : memref<8x128xf32, #tpu.memory_space<vmem>>, vector<8x32xf32>,
      %c0_98 = arith.constant 0 : index
      %c96_99 = arith.constant 96 : index
      %145 = vector.load %arg18[%c0_98, %c96_99] : memref<8x128xf32, #tpu.memory_space<vmem>>, vector<8x32xf32>
      %146 = vector.extract_strided_slice %129 {offsets = [0, 3], sizes = [8, 1], strides = [1, 1]} : vector<8x4xf32> to vector<8x1xf32>
      %147 = vector.broadcast %146 : vector<8x1xf32> to vector<8x32xf32>
      %148 = arith.mulf %145, %147 : vector<8x32xf32>
      %c0_100 = arith.constant 0 : index
      %c96_101 = arith.constant 96 : index
      %149 = vector.load %arg18[%c0_100, %c96_101] : memref<8x128xf32, #tpu.memory_space<vmem>>, vector<8x32xf32>
      tpu.vector_store %arg18[%c0_100, %c96_101], %148 {strides = array<i32>} : memref<8x128xf32, #tpu.memory_space<vmem>>, vector<8x32xf32>,
      %c0_102 = arith.constant 0 : index
      %c0_103 = arith.constant 0 : index
      %150 = vector.load %arg18[%c0_102, %c0_103] : memref<8x128xf32, #tpu.memory_space<vmem>>, vector<8x128xf32>
      %c0_104 = arith.constant 0 : index
      %c0_105 = arith.constant 0 : index
      %151 = vector.load %arg9[%c0_104, %c0_105] : memref<128x128xf32, #tpu.memory_space<vmem>>, vector<128x128xf32>
      %cst_106 = arith.constant dense<0.000000e+00> : vector<8x128xf32>
      %152 = tpu.matmul %150, %151, %cst_106 {dimension_numbers = #tpu.dot_dimension_numbers<[1], [0], [0], [1], [0, 0, 1, 1], [], []>} : vector<8x128xf32>, vector<128x128xf32>, vector<8x128xf32> -> vector<8x128xf32>
      %c0_107 = arith.constant 0 : index
      %c0_108 = arith.constant 0 : index
      %153 = vector.load %arg13[%c0_107, %c0_108] : memref<1x128xf32, #tpu.memory_space<vmem>>, vector<1x128xf32>
      %154 = vector.broadcast %153 : vector<1x128xf32> to vector<8x128xf32>
      %155 = arith.addf %152, %154 : vector<8x128xf32>
      %c0_109 = arith.constant 0 : index
      %c0_110 = arith.constant 0 : index
      %c0_111 = arith.constant 0 : index
      %156 = vector.load %arg14[%c0_109, %c0_110, %c0_111] : memref<1x8x128xf32, #tpu.memory_space<vmem>>, vector<1x8x128xf32>
      %157 = vector.shape_cast %156 : vector<1x8x128xf32> to vector<8x128xf32>
      %158 = vector.shape_cast %155 : vector<8x128xf32> to vector<1x8x128xf32>
      tpu.vector_store %arg14[%c0_109, %c0_110, %c0_111], %158 {strides = array<i32>} : memref<1x8x128xf32, #tpu.memory_space<vmem>>, vector<1x8x128xf32>,
    } else {
    }
    return
  }
  func.func @transform_0(%arg0: i32, %arg1: i32, %arg2: i32) -> (i32, i32, i32) {
    %c0_i32 = arith.constant 0 : i32
    %c0_i32_0 = arith.constant 0 : i32
    return %arg0, %arg1, %c0_i32 : i32, i32, i32
  }
  func.func @transform_1(%arg0: i32, %arg1: i32, %arg2: i32) -> (i32, i32, i32) {
    %c0_i32 = arith.constant 0 : i32
    %c0_i32_0 = arith.constant 0 : i32
    return %arg0, %arg2, %c0_i32 : i32, i32, i32
  }
  func.func @transform_2(%arg0: i32, %arg1: i32, %arg2: i32) -> (i32, i32, i32) {
    %c0_i32 = arith.constant 0 : i32
    %c0_i32_0 = arith.constant 0 : i32
    return %arg0, %arg2, %c0_i32 : i32, i32, i32
  }
  func.func @transform_3(%arg0: i32, %arg1: i32, %arg2: i32) -> (i32, i32) {
    %c0_i32 = arith.constant 0 : i32
    %c0_i32_0 = arith.constant 0 : i32
    %c0_i32_1 = arith.constant 0 : i32
    return %c0_i32, %c0_i32_0 : i32, i32
  }
  func.func @transform_4(%arg0: i32, %arg1: i32, %arg2: i32) -> (i32, i32) {
    %c0_i32 = arith.constant 0 : i32
    %c0_i32_0 = arith.constant 0 : i32
    %c0_i32_1 = arith.constant 0 : i32
    return %c0_i32, %c0_i32_0 : i32, i32
  }
  func.func @transform_5(%arg0: i32, %arg1: i32, %arg2: i32) -> (i32, i32) {
    %c0_i32 = arith.constant 0 : i32
    %c0_i32_0 = arith.constant 0 : i32
    %c0_i32_1 = arith.constant 0 : i32
    return %c0_i32, %c0_i32_0 : i32, i32
  }
  func.func @transform_6(%arg0: i32, %arg1: i32, %arg2: i32) -> (i32, i32) {
    %c0_i32 = arith.constant 0 : i32
    %c0_i32_0 = arith.constant 0 : i32
    %c0_i32_1 = arith.constant 0 : i32
    return %c0_i32, %c0_i32_0 : i32, i32
  }
  func.func @transform_7(%arg0: i32, %arg1: i32, %arg2: i32) -> (i32, i32) {
    %c0_i32 = arith.constant 0 : i32
    %c0_i32_0 = arith.constant 0 : i32
    %c0_i32_1 = arith.constant 0 : i32
    return %c0_i32, %c0_i32_0 : i32, i32
  }
  func.func @transform_8(%arg0: i32, %arg1: i32, %arg2: i32) -> (i32, i32) {
    %c0_i32 = arith.constant 0 : i32
    %c0_i32_0 = arith.constant 0 : i32
    %c0_i32_1 = arith.constant 0 : i32
    return %c0_i32, %c0_i32_0 : i32, i32
  }
  func.func @transform_9(%arg0: i32, %arg1: i32, %arg2: i32) -> (i32, i32) {
    %c0_i32 = arith.constant 0 : i32
    %c0_i32_0 = arith.constant 0 : i32
    %c0_i32_1 = arith.constant 0 : i32
    return %c0_i32, %c0_i32_0 : i32, i32
  }
  func.func @transform_10(%arg0: i32, %arg1: i32, %arg2: i32) -> (i32, i32) {
    %c0_i32 = arith.constant 0 : i32
    %c0_i32_0 = arith.constant 0 : i32
    %c0_i32_1 = arith.constant 0 : i32
    return %c0_i32, %c0_i32_0 : i32, i32
  }
  func.func @transform_11(%arg0: i32, %arg1: i32, %arg2: i32) -> (i32, i32, i32) {
    %c0_i32 = arith.constant 0 : i32
    %c0_i32_0 = arith.constant 0 : i32
    return %arg0, %arg1, %c0_i32 : i32, i32, i32
  }
}

</mosaic_0001>

<bundles_post_ra>
// kernel: tpu_custom_call.1
= control target key start
LH: loop header
LB: loop body
LE: loop exit
PB: predicated region body
PF: predicated region fallthrough
CT: control target
= control target key end

     0   :  { %s3272_s0 = inlined_call_operand.hbm [shape: f32[2,8,128], index: 0, kind: input, shape index: {}]   ;;  %s3273_s1 = inlined_call_operand.hbm [shape: f32[2,8,128], index: 1, kind: input, shape index: {}]   ;;  %s3274_s2 = inlined_call_operand.hbm [shape: f32[2,8,128], index: 2, kind: input, shape index: {}]   ;;  %s3275_s3 = inlined_call_operand.hbm [shape: f32[128,128], index: 3, kind: input, shape index: {}]   ;;  %s3276_s4 = inlined_call_operand.hbm [shape: f32[128,128], index: 4, kind: input, shape index: {}]   ;;  %s3277_s5 = inlined_call_operand.hbm [shape: f32[128,128], index: 5, kind: input, shape index: {}]   ;;  %s3278_s6 = inlined_call_operand.hbm [shape: f32[128,128], index: 6, kind: input, shape index: {}]   ;;  %s3279_s7 = inlined_call_operand.vmem [shape: f32[1,128], index: 7, kind: input, shape index: {}]   ;;  %s3280_s8 = inlined_call_operand.vmem [shape: f32[1,128], index: 8, kind: input, shape index: {}]   ;;  %s3281_s9 = inlined_call_operand.vmem [shape: f32[1,128], index: 9, kind: input, shape index: {}]   ;;  %s3282_s10 = inlined_call_operand.vmem [shape: f32[1,128], index: 10, kind: input, shape index: {}]   ;;  %s3283_s11 = inlined_call_operand.hbm [shape: f32[2,8,128], index: 11, kind: output, shape index: {}]  }
   0x1   :  { %3302 = sst [smem:[#allocation31_spill]] %s3273_s1 }
   0x2   :  { %3303 = sst [smem:[#allocation32_spill]] %s3275_s3 }
   0x3   :  { %3304 = sst [smem:[#allocation33_spill]] %s3276_s4 }
   0x4   :  { %3305 = sst [smem:[#allocation34_spill]] %s3277_s5 }
   0x5   :  { %3306 = sst [smem:[#allocation35_spill]] %s3282_s10 }
   0x6   :  { %3307 = sst [smem:[#allocation36_spill]] %s3283_s11 }
   0x7   :  { %16 = vsyncpa [#allocation7], 0 }
   0x8   :  { %18 = vsyncpa [#allocation7 + $0x1], 0 }
   0x9   :  { %19 = vsyncpa [#allocation10], 0 }
   0xa   :  { %21 = vsyncpa [#allocation10 + $0x1], 0 }
   0xb   :  { %22 = vsyncpa [#allocation13], 0 }
   0xc   :  { %23 = vsyncpa [#allocation16], 0 }
   0xd   :  { %24 = vsyncpa [#allocation8], 0 }
   0xe   :  { %26 = vsyncpa [#allocation8 + $0x1], 0  ;;  %s2763_s17 = smov 0   ;;  %s2765_s18 = smov 0  }
   0xf   :  { %s2767_s19 = smov 0   ;;  %s2769_s20 = smov 0  }
  0x10   :  { %s2771_s21 = smov 0   ;;  %s2773_s22 = smov 0  }
  0x11 LB: > { %3308 = sst [smem:[#allocation24_spill]] %s2661_s17  ;;  %s2794_s23 = sadd.s32 4294967295, %s2681_s22   ;;  %s2681_s22 = sphi %s2773_s22, %s32_s22   ;;  %s2677_s21 = sphi %s2771_s21, %s3349_s21   ;;  %s2673_s20 = sphi %s2769_s20, %s3348_s20   ;;  %s2669_s19 = sphi %s2767_s19, %s3352_s19   ;;  %s2665_s18 = sphi %s2765_s18, %s3351_s18   ;;  %s2661_s17 = sphi %s2763_s17, %s3350_s17  }
  0x12   : > { %3309 = sst [smem:[#allocation25_spill]] %s2677_s21  ;;  %p1940_p0 = scmp.ge.s32.totalorder %s2681_s22, 1 }
  0x13   : > { %3310 = sst [smem:[#allocation26_spill]] %s2681_s22  ;;  %p3296_p1 = scmp.eq.s32.totalorder %s2794_s23, 0 }
  0x14   : > { %p336_p2 = scmp.lt.s32.totalorder %s2681_s22, 3  ;;  %s2683_s25 = smov [#allocation12]  }
  0x15   : > { %s348_s26 = sshll.u32 %s2683_s25, 4  ;;  %s2684_s28 = smov [#allocation15]   ;;  %s349_s26 = int_to_ptr.vmem [resolvable:$true] %s348_s26 }
  0x16   : > { %p2799_p3 = pnand %p1940_p0, %p336_p2  ;;  %s374_s29 = sshll.u32 %s2684_s28, 4  ;;  %s375_s29 = int_to_ptr.vmem [resolvable:$true] %s374_s29 }
  0x17   : > { %s2412_s30 = scalar_lea.vmem %s349_s26, 2048  ;;  %p2420_p11 = scmp.lt.s32.totalorder %s349_s26, %s349_s26 }
  0x18   : > { %p2269_p4 = pneg %p2799_p3  ;;  %p2413_p8 = scmp.ne.s32.totalorder %s349_s26, %s2412_s30 }
  0x19   : > { %p2421_p12 = scmp.lt.s32.totalorder %s2412_s30, %s2412_s30 }
  0x1a   : > { %p2808_p6 = pnand %p2269_p4, %p3296_p1 }
  0x1b   : > { %p2422_p13 = por %p2421_p12, %p2420_p11 }
  0x1c   : > { %p3297_p7 = pneg %p2808_p6 }
  0x1e   : > { %p2415_p9 = pnand %p2413_p8, %p3297_p7 }
  0x20   : > { %p2416_p10 = pneg %p2415_p9 }
  0x22   : > { %p2423_p0 = pnand %p2422_p13, %p2416_p10 }
  0x24   : > { %2426 = shalt.err (!%p2423_p0)
}
  0x25   : > { %s3284_s12 = smov 128   ;;  %s3286_s13 = smov 8  }
  0x26   : > { %s3313_s3 = sld [smem:[#allocation32_spill]]  ;;  %s2438_s16 = scalar_lea.vmem %s375_s29, 2048 }
  0x27   : > { %p2439_p2 = scmp.ne.s32.totalorder %s375_s29, %s2438_s16  ;;  %p2446_p9 = scmp.lt.s32.totalorder %s375_s29, %s375_s29 }
  0x28   : > { %p2447_p10 = scmp.lt.s32.totalorder %s2438_s16, %s2438_s16 }
  0x29   : > { %p2441_p4 = pnand %p2439_p2, %p3297_p7 }
  0x2a   : > { %p2448_p11 = por %p2447_p10, %p2446_p9 }
  0x2b   : > { %p2442_p8 = pneg %p2441_p4 }
  0x2c   : > { %2272 = dma.hbm_to_vmem [thread:$0]  (!%p2808_p6), %s3313_s3, 2048, %s349_s26, [#allocation13], %s3284_s12, %s3284_s12, %s3286_s13  }
  0x2d   : > { %p2449_p12 = pnand %p2448_p11, %p2442_p8 }
  0x2f   : > { %2452 = shalt.err (!%p2449_p12)
}
  0x30   : > { %s3314_s5 = sld [smem:[#allocation34_spill]]  ;;  %s1939_s26 = sadd.s32 4294967294, %s2681_s22  }
  0x31   : > { %s51_s30 = sadd.s32 1, %s2677_s21  ;;  %s60_s14 = sadd.s32 1, %s2669_s19 }
  0x32   : > { %p53_p13 = scmp.ge.s32.totalorder %s51_s30, 2  ;;  %p67_p0 = scmp.ne.s32.totalorder %s2669_s19, %s2665_s18 }
  0x33   : > { %p68_p2 = scmp.eq.s32.totalorder %s2681_s22, 0  ;;  %p73_p8 = scmp.ne.s32.totalorder %s2665_s18, %s2661_s17 }
  0x34   : > { %s3354_s30 = smov (%p53_p13, %s51_s30), 0  ;;  %p323_p9 = scmp.eq.s32.totalorder %s2794_s23, 1 }
  0x35   : > { %3315 = sst [smem:[#allocation27_spill]] %s3354_s30  ;;  %p2844_p4 = por %p68_p2, %p67_p0 }
  0x36   : > { %2278 = dma.hbm_to_vmem [thread:$0]  (!%p2808_p6), %s3314_s5, 2048, %s375_s29, [#allocation16], %s3284_s12, %s3284_s12, %s3286_s13  }
  0x37   : > { %s55_s29 = ssub.s32 %s2677_s21, %s3354_s30  ;;  %p2855_p11 = por %p3296_p1, %p73_p8 }
  0x38   : > { %p58_p10 = scmp.eq.s32.totalorder %s55_s29, 0  ;;  %p2859_p12 = por %p323_p9, %p67_p0 }
  0x39   : > { %p329_p13 = scmp.eq.s32.totalorder %s1939_s26, 1  ;;  %p2300_p5 = scmp.lt.s32.totalorder %s2681_s22, 2 }
  0x3a   : > { %s3318_s25 = scalar_select %p2859_p12, 1, 0 }
  0x3b   : > { %s2864_s28 = scalar_select %p58_p10, %s2669_s19, %s60_s14  }
  0x3c   : > { %3319 = sst [smem:[#allocation28_spill]] %s3318_s25  ;;  %p2866_p2 = por %p329_p13, %p73_p8 }
  0x3d   : > { %3320 = sst [smem:[#allocation29_spill]] %s2864_s28  ;;  %s3292_s13 = sand.u32 1, %s2669_s19  }
  0x3e   : > { %s3321_s12 = scalar_select %p2866_p2, 1, 0 }
  0x3f   : > { %s2873_s3 = sshll.u32 %s2677_s21, 7  ;;  %s2877_s29 = sshll.u32 %s3292_s13, 3 }
  0x40   : > { %3322 = sst [smem:[#allocation30_spill]] %s3321_s12  ;;  %p2881_p0 = pnand %p2300_p5, %p2844_p4 }
  0x41   : > { %s432_s26 = sand.u32 1, %s2681_s22   ;;  %s3324_s1 = sld [smem:[#allocation31_spill]] }
  0x42   : > { %s436_s12 = scalar_lea.vmem [#allocation9], %s2877_s29  ;;  %s2891_s17 = scalar_lea.sflag [#allocation10], %s432_s26 }
  0x43   : > { %s444_s21 = sshll.u32 %s436_s12, 4  ;;  %p3298_p8 = pneg %p2881_p0  ;;  %s445_s21 = int_to_ptr.vmem [resolvable:$true] %s444_s21 }
  0x44   : > { %s2466_s15 = scalar_lea.vmem %s445_s21, 128  ;;  %s2687_s13 = smov [#allocation9]  }
  0x45   : > { %p2467_p9 = scmp.ne.s32.totalorder %s445_s21, %s2466_s15  ;;  %s2471_s11 = sshll.u32 %s2687_s13, 4  ;;  %s2472_s11 = int_to_ptr.vmem [resolvable:$false] %s2471_s11 }
  0x46   : > { %s2473_s22 = scalar_lea.vmem %s2472_s11, 256  ;;  %p2474_p10 = scmp.lt.s32.totalorder %s445_s21, %s2472_s11 }
  0x47   : > { %s442_s28 = scalar_lea.hbm %s3324_s1, %s2873_s3  ;;  %p2469_p5 = pnand %p2467_p9, %p3298_p8 }
  0x48   : > { %p2475_p13 = scmp.lt.s32.totalorder %s2473_s22, %s2466_s15 }
  0x49   : > { %p2470_p4 = pneg %p2469_p5 }
  0x4a   : > { %p2476_p1 = por %p2475_p13, %p2474_p10 }
  0x4c   : > { %p2477_p7 = pnand %p2476_p1, %p2470_p4 }
  0x4e   : > { %2480 = shalt.err (!%p2477_p7)
}
  0x4f   : > { %2288 = dma.hbm_to_vmem [thread:$0]  (!%p2881_p0), %s442_s28, 128, %s445_s21, %s2891_s17  }
  0x50   : > { %s2688_s12 = smov [#allocation14]   ;;  %s2689_s26 = smov [#allocation17]  }
  0x51   : > { %s361_s30 = sshll.u32 %s2688_s12, 4  ;;  %s387_s14 = sshll.u32 %s2689_s26, 4  ;;  %s362_s30 = int_to_ptr.vmem [resolvable:$true] %s361_s30  ;;  %s388_s14 = int_to_ptr.vmem [resolvable:$true] %s387_s14 }
  0x52   : > { %s2492_s1 = scalar_lea.vmem %s362_s30, 2048  ;;  %p3325_p5 = pneg %p2808_p6 }
  0x53   : > { %p2493_p9 = scmp.ne.s32.totalorder %s362_s30, %s2492_s1  ;;  %p2500_p12 = scmp.lt.s32.totalorder %s362_s30, %s362_s30 }
  0x54   : > { %p2501_p10 = scmp.lt.s32.totalorder %s2492_s1, %s2492_s1 }
  0x55   : > { %p2495_p8 = pnand %p2493_p9, %p3325_p5 }
  0x56   : > { %p2502_p1 = por %p2501_p10, %p2500_p12 }
  0x57   : > { %p2496_p2 = pneg %p2495_p8 }
  0x59   : > { %p2503_p7 = pnand %p2502_p1, %p2496_p2 }
  0x5b   : > { %2506 = shalt.err (!%p2503_p7)
}
  0x5c   : > { %s3326_s11 = smov 8   ;;  %s3327_s21 = smov 128  }
  0x5d   : > { %s3328_s4 = sld [smem:[#allocation33_spill]]  ;;  %s2518_s28 = scalar_lea.vmem %s388_s14, 2048 }
  0x5e   : > { %p2519_p4 = scmp.ne.s32.totalorder %s388_s14, %s2518_s28  ;;  %p3329_p8 = pmov %p3325_p5 }
  0x5f   : > { %p2526_p12 = scmp.lt.s32.totalorder %s388_s14, %s388_s14  ;;  %p2527_p2 = scmp.lt.s32.totalorder %s2518_s28, %s2518_s28 }
  0x60   : > { %p2521_p13 = pnand %p2519_p4, %p3329_p8 }
  0x61   : > { %p2528_p5 = por %p2527_p2, %p2526_p12 }
  0x62   : > { %p2522_p9 = pneg %p2521_p13 }
  0x63   : > { %2275 = dma.hbm_to_vmem [thread:$0]  (!%p2808_p6), %s3328_s4, 2048, %s362_s30, [#allocation13], %s3327_s21, %s3327_s21, %s3326_s11  }
  0x64   : > { %p2529_p10 = pnand %p2528_p5, %p2522_p9 }
  0x66   : > { %2532 = shalt.err (!%p2529_p10)
}
  0x67   : > { %2281 = dma.hbm_to_vmem [thread:$0]  (!%p2808_p6), %s3278_s6, 2048, %s388_s14, [#allocation16], %s3327_s21, %s3327_s21, %s3326_s11  }
  0x68   : > { %s423_s26 = scalar_lea.hbm %s3272_s0, %s2873_s3  ;;  %s417_s22 = scalar_lea.vmem [#allocation6], %s2877_s29 }
  0x69   : > { %s425_s13 = sshll.u32 %s417_s22, 4  ;;  %s461_s4 = scalar_lea.hbm %s3274_s2, %s2873_s3  ;;  %s426_s13 = int_to_ptr.vmem [resolvable:$true] %s425_s13 }
  0x6a   : > { %s3330_s10 = sand.u32 1, %s2669_s19   ;;  %s2546_s1 = scalar_lea.vmem %s426_s13, 128 }
  0x6b   : > { %s414_s25 = scalar_lea.sflag [#allocation7], %s3330_s10  ;;  %p2547_p1 = scmp.ne.s32.totalorder %s426_s13, %s2546_s1 }
  0x6c   : > { %p3331_p7 = pneg %p2881_p0  ;;  %s2690_s14 = smov [#allocation6]  }
  0x6d   : > { %s2551_s11 = sshll.u32 %s2690_s14, 4  ;;  %s2552_s11 = int_to_ptr.vmem [resolvable:$false] %s2551_s11 }
  0x6e   : > { %p2549_p4 = pnand %p2547_p1, %p3331_p7  ;;  %s2553_s21 = scalar_lea.vmem %s2552_s11, 256 }
  0x6f   : > { %p2554_p6 = scmp.lt.s32.totalorder %s426_s13, %s2552_s11  ;;  %p2555_p13 = scmp.lt.s32.totalorder %s2553_s21, %s2546_s1 }
  0x70   : > { %p2550_p8 = pneg %p2549_p4 }
  0x71   : > { %p2556_p9 = por %p2555_p13, %p2554_p6 }
  0x73   : > { %p2557_p12 = pnand %p2556_p9, %p2550_p8 }
  0x75   : > { %2560 = shalt.err (!%p2557_p12)
}
  0x76   : > { %2285 = dma.hbm_to_vmem [thread:$0]  (!%p2881_p0), %s423_s26, 128, %s426_s13, %s414_s25  }
  0x77   : > { %s455_s10 = scalar_lea.vmem [#allocation11], %s2877_s29  ;;  %p3332_p5 = pmov %p3331_p7 }
  0x78   : > { %s463_s15 = sshll.u32 %s455_s10, 4  ;;  %s2691_s30 = smov [#allocation11]   ;;  %s464_s15 = int_to_ptr.vmem [resolvable:$true] %s463_s15 }
  0x79   : > { %s2574_s12 = scalar_lea.vmem %s464_s15, 128  ;;  %s2579_s22 = sshll.u32 %s2691_s30, 4  ;;  %s2580_s22 = int_to_ptr.vmem [resolvable:$false] %s2579_s22 }
  0x7a   : > { %p2575_p2 = scmp.ne.s32.totalorder %s464_s15, %s2574_s12  ;;  %s2581_s27 = scalar_lea.vmem %s2580_s22, 256 }
  0x7b   : > { %p2582_p7 = scmp.lt.s32.totalorder %s464_s15, %s2580_s22  ;;  %p2583_p4 = scmp.lt.s32.totalorder %s2581_s27, %s2574_s12 }
  0x7c   : > { %p2577_p10 = pnand %p2575_p2, %p3332_p5 }
  0x7d   : > { %p2584_p8 = por %p2583_p4, %p2582_p7 }
  0x7e   : > { %p2578_p1 = pneg %p2577_p10 }
  0x80   : > { %p2585_p6 = pnand %p2584_p8, %p2578_p1 }
  0x82   : > { %2588 = shalt.err (!%p2585_p6)
}
  0x83   : > { %2291 = dma.hbm_to_vmem [thread:$0]  (!%p2881_p0), %s461_s4, 128, %s464_s15, %s2891_s17  }
  0x84   : > { %472 = sbr.rel (%p2799_p3) target bundleno = 2865 (0xb31), region = 64  ;;  %s2954_s26 = sand.u32 (!%p2799_p3), 1, %s2665_s18  }
  0x85   : > { %s2957_s13 = sshll.u32 (!%p2799_p3), %s2954_s26, 3  ;;  %s475_s5 = scalar_lea.sflag (!%p2799_p3), [#allocation7], %s2954_s26 }
  0x86   : > { %s478_s28 = scalar_lea.vmem (!%p2799_p3), [#allocation6], %s2957_s13 }
  0x89   : > { %2640 = dma.done.wait (%p2855_p11), %s475_s5, 128  }
  0x8a   : > { %2642 = vsyncadd (%p2855_p11), %s475_s5, 4294967168  ;;  %s483_s3 = sand.u32 1, %s2794_s23   ;;  %s487_s17 = scalar_lea.vmem [#allocation9], %s2957_s13 }
  0x8b   : > { %s484_s4 = scalar_lea.sflag [#allocation10], %s483_s3 }
  0x8c   : > { %2644 = dma.done.wait (%p2855_p11), %s484_s4, 256  }
  0x8d   : > { %2646 = vsyncadd (%p2855_p11), %s484_s4, 4294967040  ;;  %s496_s24 = scalar_lea.vmem [#allocation11], %s2957_s13  ;;  %p3333_p3 = scmp.eq.s32.totalorder %s2794_s23, 0 }
  0x8f   : > { %2648 = dma.done.wait (%p3333_p3), [#allocation13], 4096   ;;  %p3334_p0 = pmov %p3333_p3 }
  0x91   : > { %2650 = vsyncadd (%p3334_p0), [#allocation13], 4294963200  ;;  %p3335_p13 = pmov %p3334_p0 }
  0x92   : > { %p3336_p9 = pmov %p3334_p0 }
  0x93   : > { %2652 = dma.done.wait (%p3335_p13), [#allocation16], 4096  }
  0x94   : > { %2654 = vsyncadd (%p3336_p9), [#allocation16], 4294963200  ;;  %v2692_v0 = vmov 0.0   ;;  %vm2693_vm0 = vmmov 0   ;;  %v581_v1 = vld [vmem:[#allocation12 + $0x78] sm:$0xff]  ;;  %v580_v3 = vld [vmem:[#allocation12 + $0x70] sm:$0xff] }
  0x95   : > { %2065 = vmatprep.subr.mxu0 %v2692_v0  ;;  %664 = vst [vmem:[#allocation5] sm:$0xff] %v2692_v0  ;;  %2100 = vmatprep.subr.mxu1 %v2692_v0  ;;  %v681_v2 = vld [vmem:[#allocation14 + $0x78] sm:$0xff]  ;;  %v680_v4 = vld [vmem:[#allocation14 + $0x70] sm:$0xff]  ;;  %v579_v5 = vld [vmem:[#allocation12 + $0x68] sm:$0xff]  ;;  %vm854_vm1 = vcmask 261120   ;;  %s2694_s11 = smov 96  }
  0x96   : > { %2097 = vmatprep.mubr.msk.f32.mxu0 %vm2693_vm0, %v2692_v0  ;;  %2132 = vmatprep.mubr.msk.f32.mxu1 %vm2693_vm0, %v2692_v0  ;;  %v679_v6 = vld [vmem:[#allocation14 + $0x68] sm:$0xff]  ;;  %v578_v7 = vld [vmem:[#allocation12 + $0x60] sm:$0xff]  ;;  %v577_v9 = vld [vmem:[#allocation12 + $0x58] sm:$0xff]  ;;  %vm661_vm2 = vcmask 31744   ;;  %v2695_v61 = vmov -inf   ;;  %vm932_vm3 = vcmask 64512  }
  0x97   : > { %2066 = vmatpush3.msra.mxu0 %v581_v1  ;;  %2101 = vmatpush3.msra.mxu1 %v681_v2  ;;  %v678_v8 = vld [vmem:[#allocation14 + $0x60] sm:$0xff]  ;;  %v677_v10 = vld [vmem:[#allocation14 + $0x58] sm:$0xff]  ;;  %v576_v11 = vld [vmem:[#allocation12 + $0x50] sm:$0xff]  ;;  %662 = vst.msk [vmem:[#allocation3] sm:$0xff] %vm661_vm2, %v2695_v61  ;;  %v2696_v2 = vmov 0   ;;  %vm954_vm4 = vcmask 7168  }
  0x98   : > { %2067 = vmatprep.subr.mxu0 %v2692_v0  ;;  %2102 = vmatprep.subr.mxu1 %v2692_v0  ;;  %v676_v12 = vld [vmem:[#allocation14 + $0x50] sm:$0xff]  ;;  %v575_v13 = vld [vmem:[#allocation12 + $0x48] sm:$0xff]  ;;  %v574_v15 = vld [vmem:[#allocation12 + $0x40] sm:$0xff]  ;;  %663 = vst.msk [vmem:[#allocation4] sm:$0xff] %vm661_vm2, %v2692_v0  ;;  %s2697_s15 = smov 64   ;;  %vm1141_vm5 = vcmask 15368  }
  0x99   : > { %2068 = vmatpush3.msra.mxu0 %v580_v3  ;;  %2103 = vmatpush3.msra.mxu1 %v680_v4  ;;  %v675_v14 = vld [vmem:[#allocation14 + $0x48] sm:$0xff]  ;;  %v674_v16 = vld [vmem:[#allocation14 + $0x40] sm:$0xff]  ;;  %v573_v17 = vld [vmem:[#allocation12 + $0x38] sm:$0xff]  ;;  %vm1337_vm6 = vcmask 23568   ;;  %s2700_s12 = smov 32   ;;  %vm1532_vm7 = vcmask 31768  }
  0x9a   : > { %2069 = vmatprep.subr.mxu0 %v2692_v0  ;;  %2104 = vmatprep.subr.mxu1 %v2692_v0  ;;  %v673_v18 = vld [vmem:[#allocation14 + $0x38] sm:$0xff]  ;;  %v572_v19 = vld [vmem:[#allocation12 + $0x30] sm:$0xff]  ;;  %v571_v21 = vld [vmem:[#allocation12 + $0x28] sm:$0xff]  ;;  %vm1232_vm8 = vcmask 523520   ;;  %vm1427_vm9 = vcmask 785920   ;;  %vm1622_vm10 = vcmask 1048320  }
  0x9b   : > { %2070 = vmatpush3.msra.mxu0 %v579_v5  ;;  %2105 = vmatpush3.msra.mxu1 %v679_v6  ;;  %v672_v20 = vld [vmem:[#allocation14 + $0x30] sm:$0xff]  ;;  %v671_v22 = vld [vmem:[#allocation14 + $0x28] sm:$0xff]  ;;  %v570_v23 = vld [vmem:[#allocation12 + $0x20] sm:$0xff]  ;;  %s3337_s30 = sld [smem:[#allocation28_spill]]  ;;  %s1978_s29 = sshll.u32 %s2673_s20, 7 }
  0x9c   : > { %2071 = vmatprep.subr.mxu0 %v2692_v0  ;;  %2106 = vmatprep.subr.mxu1 %v2692_v0  ;;  %v670_v24 = vld [vmem:[#allocation14 + $0x20] sm:$0xff]  ;;  %v569_v25 = vld [vmem:[#allocation12 + $0x18] sm:$0xff]  ;;  %v568_v27 = vld [vmem:[#allocation12 + $0x10] sm:$0xff]  ;;  %s3338_s25 = sld [smem:[#allocation35_spill]]  ;;  %s560_s5 = scalar_lea.vmem [#allocation18], %s2957_s13 }
  0x9d   : > { %2072 = vmatpush3.msra.mxu0 %v578_v7  ;;  %2107 = vmatpush3.msra.mxu1 %v678_v8  ;;  %v669_v26 = vld [vmem:[#allocation14 + $0x18] sm:$0xff]  ;;  %v668_v28 = vld [vmem:[#allocation14 + $0x10] sm:$0xff]  ;;  %v567_v29 = vld [vmem:[#allocation12 + $0x8] sm:$0xff]  ;;  %s1758_s16 = scalar_lea.sflag [#allocation8], %s2954_s26  ;;  %s2702_s14 = smov [#allocation18]  }
  0x9e   : > { %2073 = vmatprep.subr.mxu0 %v2692_v0  ;;  %2108 = vmatprep.subr.mxu1 %v2692_v0  ;;  %v667_v30 = vld [vmem:[#allocation14 + $0x8] sm:$0xff]  ;;  %v566_v31 = vld [vmem:[#allocation12] sm:$0xff]  ;;  %v565_v33 = vld [vmem:[%s478_s28] sm:$0xff]  ;;  %s1772_s28 = sshll.u32 %s560_s5, 4  ;;  %s2593_s20 = sshll.u32 %s2702_s14, 4  ;;  %s1773_s28 = int_to_ptr.vmem [resolvable:$true] %s1772_s28  ;;  %s2594_s20 = int_to_ptr.vmem [resolvable:$false] %s2593_s20 }
  0x9f   : > { %2074 = vmatpush3.msra.mxu0 %v577_v9  ;;  %2109 = vmatpush3.msra.mxu1 %v677_v10  ;;  %v666_v32 = vld [vmem:[#allocation14] sm:$0xff]  ;;  %v775_v35 = vld [vmem:[#allocation15 + $0x78] sm:$0xff]  ;;  %v774_v36 = vld [vmem:[#allocation15 + $0x70] sm:$0xff]  ;;  %s2589_s1 = scalar_lea.vmem %s1773_s28, 128  ;;  %s2595_s13 = scalar_lea.vmem %s2594_s20, 256 }
  0xa0   : > { %2075 = vmatprep.subr.mxu0 %v2692_v0  ;;  %2110 = vmatprep.subr.mxu1 %v2692_v0  ;;  %v665_v34 = vld [vmem:[%s487_s17] sm:$0xff]  ;;  %v771_v39 = vld [vmem:[#allocation15 + $0x58] sm:$0xff]  ;;  %v770_v40 = vld [vmem:[#allocation15 + $0x50] sm:$0xff]  ;;  %s3339_s17 = sld [smem:[#allocation36_spill]]  ;;  %p2590_p11 = scmp.ne.s32.totalorder %s1773_s28, %s2589_s1 }
  0xa1   : > { %2076 = vmatpush3.msra.mxu0 %v576_v11  ;;  %2111 = vmatpush3.msra.mxu1 %v676_v12  ;;  %v773_v37 = vld [vmem:[#allocation15 + $0x68] sm:$0xff]  ;;  %v772_v38 = vld [vmem:[#allocation15 + $0x60] sm:$0xff]  ;;  %v1961_v41 = vld [vmem:[%s3279_s7] ss:$0 sm:$0xff]  ;;  %p3341_p12 = scmp.ne.s32.totalorder %s3337_s30, 0  ;;  %p2596_p10 = scmp.lt.s32.totalorder %s1773_s28, %s2594_s20 }
  0xa2   : > { %2077 = vmatprep.subr.mxu0 %v2692_v0  ;;  %2112 = vmatprep.subr.mxu1 %v2692_v0  ;;  %v1962_v42 = vld [vmem:[%s3280_s8] ss:$0 sm:$0xff]  ;;  %v769_v43 = vld [vmem:[#allocation15 + $0x48] sm:$0xff]  ;;  %v768_v50 = vld [vmem:[#allocation15 + $0x40] sm:$0xff]  ;;  %p2597_p1 = scmp.lt.s32.totalorder %s2595_s13, %s2589_s1 }
  0xa3   : > { %2078 = vmatpush3.msra.mxu0 %v575_v13  ;;  %2113 = vmatpush3.msra.mxu1 %v675_v14  ;;  %v767_v52 = vld [vmem:[#allocation15 + $0x38] sm:$0xff]  ;;  %v766_v53 = vld [vmem:[#allocation15 + $0x30] sm:$0xff]  ;;  %v765_v54 = vld [vmem:[#allocation15 + $0x28] sm:$0xff]  ;;  %p2591_p2 = pnand %p2590_p11, %p3341_p12 }
  0xa4   : > { %2079 = vmatprep.subr.mxu0 %v2692_v0  ;;  %2114 = vmatprep.subr.mxu1 %v2692_v0  ;;  %v764_v55 = vld [vmem:[#allocation15 + $0x20] sm:$0xff]  ;;  %v763_v56 = vld [vmem:[#allocation15 + $0x18] sm:$0xff]  ;;  %v762_v57 = vld [vmem:[#allocation15 + $0x10] sm:$0xff]  ;;  %p2598_p7 = por %p2597_p1, %p2596_p10 }
  0xa5   : > { %2080 = vmatpush3.msra.mxu0 %v574_v15  ;;  %2115 = vmatpush3.msra.mxu1 %v674_v16  ;;  %v761_v58 = vld [vmem:[#allocation15 + $0x8] sm:$0xff]  ;;  %v760_v59 = vld [vmem:[#allocation15] sm:$0xff]  ;;  %v759_v60 = vld [vmem:[%s496_s24] sm:$0xff]  ;;  %p2592_p5 = pneg %p2591_p2 }
  0xa6   : > { %2081 = vmatprep.subr.mxu0 %v2692_v0  ;;  %2116 = vmatprep.subr.mxu1 %v2692_v0  ;;  %v1963_v3 = vld [vmem:[%s3281_s9] ss:$0 sm:$0xff]  ;;  %s3340_s24 = smov %s3339_s17  ;;  %s3230_s23 = scalar_lea.hbm %s3339_s17, %s1978_s29 }
  0xa7   : > { %2082 = vmatpush3.msra.mxu0 %v573_v17  ;;  %2117 = vmatpush3.msra.mxu1 %v673_v18  ;;  %v3078_v7 = vld [vmem:[#allocation3] sm:$0xff]  ;;  %p2599_p4 = pnand %p2598_p7, %p2592_p5 }
  0xa8   : > { %2083 = vmatprep.subr.mxu0 %v2692_v0  ;;  %2118 = vmatprep.subr.mxu1 %v2692_v0 }
  0xa9   : > { %2084 = vmatpush3.msra.mxu0 %v572_v19  ;;  %2119 = vmatpush3.msra.mxu1 %v672_v20 }
  0xaa   : > { %2085 = vmatprep.subr.mxu0 %v2692_v0  ;;  %2120 = vmatprep.subr.mxu1 %v2692_v0 }
  0xab   : > { %2086 = vmatpush3.msra.mxu0 %v571_v21  ;;  %2121 = vmatpush3.msra.mxu1 %v671_v22 }
  0xac   : > { %2087 = vmatprep.subr.mxu0 %v2692_v0  ;;  %2122 = vmatprep.subr.mxu1 %v2692_v0 }
  0xad   : > { %2088 = vmatpush3.msra.mxu0 %v570_v23  ;;  %2123 = vmatpush3.msra.mxu1 %v670_v24  ;;  %v2698_v23 = vmov 1  }
  0xae   : > { %2089 = vmatprep.subr.mxu0 %v2692_v0  ;;  %2124 = vmatprep.subr.mxu1 %v2692_v0 }
  0xaf   : > { %2090 = vmatpush3.msra.mxu0 %v569_v25  ;;  %2125 = vmatpush3.msra.mxu1 %v669_v26 }
  0xb0   : > { %2091 = vmatprep.subr.mxu0 %v2692_v0  ;;  %2126 = vmatprep.subr.mxu1 %v2692_v0 }
  0xb1   : > { %2092 = vmatpush3.msra.mxu0 %v568_v27  ;;  %2127 = vmatpush3.msra.mxu1 %v668_v28 }
  0xb2   : > { %2093 = vmatprep.subr.mxu0 %v2692_v0  ;;  %2128 = vmatprep.subr.mxu1 %v2692_v0 }
  0xb3   : > { %2094 = vmatpush3.msra.mxu0 %v567_v29  ;;  %2129 = vmatpush3.msra.mxu1 %v667_v30 }
  0xb4   : > { %2095 = vmatprep.subr.mxu0 %v2692_v0  ;;  %2130 = vmatprep.subr.mxu1 %v2692_v0 }
  0xb5   : > { %2096 = vmatpush3.msra.mxu0 %v566_v31  ;;  %2131 = vmatpush3.msra.mxu1 %v666_v32 }
  0xb6   : > { %2098 = vmatmul.mubr.f32.vlgmr.msra.gmra.mxu0 %v565_v33  ;;  %2133 = vmatmul.mubr.f32.vlgmr.msra.gmra.mxu1 %v665_v34 }
  0xb7   : > { %2170 = vmatprep.subr.mxu1 %v2692_v0  ;;  %2172 = vmatprep.mubr.msk.f32.mxu1 %vm2693_vm0, %v2692_v0 }
  0xb8   : > { %2135 = vmatprep.subr.mxu0 %v2692_v0  ;;  %2167 = vmatprep.mubr.msk.f32.mxu0 %vm2693_vm0, %v2692_v0 }
  0xb9   : > { %2136 = vmatpush3.msra.mxu0 %v775_v35  ;;  %2370 = vset.pattern.permute.xlu0 %v2696_v2 }
  0xba   : > { %2137 = vmatprep.subr.mxu0 %v2692_v0  ;;  %2371 = vset.pattern.permute.xlu1 %v2698_v23 }
  0xbb   : > { %2138 = vmatpush3.msra.mxu0 %v774_v36 }
  0xbc   : > { %2139 = vmatprep.subr.mxu0 %v2692_v0 }
  0xbd   : > { %2140 = vmatpush3.msra.mxu0 %v773_v37 }
  0xbe   : > { %2141 = vmatprep.subr.mxu0 %v2692_v0 }
  0xbf   : > { %2142 = vmatpush3.msra.mxu0 %v772_v38 }
  0xc0   : > { %2143 = vmatprep.subr.mxu0 %v2692_v0 }
  0xc1   : > { %2144 = vmatpush3.msra.mxu0 %v771_v39  ;;  %v2699_v39 = vmov 2  }
  0xc2   : > { %2145 = vmatprep.subr.mxu0 %v2692_v0 }
  0xc3   : > { %2146 = vmatpush3.msra.mxu0 %v770_v40 }
  0xc4   : > { %2147 = vmatprep.subr.mxu0 %v2692_v0 }
  0xc5   : > { %2148 = vmatpush3.msra.mxu0 %v769_v43 }
  0xc6   : > { %2149 = vmatprep.subr.mxu0 %v2692_v0 }
  0xc7   : > { %2150 = vmatpush3.msra.mxu0 %v768_v50 }
  0xc8   : > { %2151 = vmatprep.subr.mxu0 %v2692_v0 }
  0xc9   : > { %2152 = vmatpush3.msra.mxu0 %v767_v52 }
  0xca   : > { %2153 = vmatprep.subr.mxu0 %v2692_v0 }
  0xcb   : > { %2154 = vmatpush3.msra.mxu0 %v766_v53 }
  0xcc   : > { %2155 = vmatprep.subr.mxu0 %v2692_v0 }
  0xcd   : > { %2156 = vmatpush3.msra.mxu0 %v765_v54 }
  0xce   : > { %2157 = vmatprep.subr.mxu0 %v2692_v0 }
  0xcf   : > { %2158 = vmatpush3.msra.mxu0 %v764_v55 }
  0xd0   : > { %2159 = vmatprep.subr.mxu0 %v2692_v0 }
  0xd1   : > { %2160 = vmatpush3.msra.mxu0 %v763_v56  ;;  %v2701_v56 = vmov 3  }
  0xd2   : > { %2161 = vmatprep.subr.mxu0 %v2692_v0 }
  0xd3   : > { %2162 = vmatpush3.msra.mxu0 %v762_v57 }
  0xd4   : > { %2163 = vmatprep.subr.mxu0 %v2692_v0 }
  0xd5   : > { %2164 = vmatpush3.msra.mxu0 %v761_v58 }
  0xd6   : > { %2165 = vmatprep.subr.mxu0 %v2692_v0 }
  0xd7   : > { %2166 = vmatpush3.msra.mxu0 %v760_v59 }
  0xd8   : > { %2168 = vmatmul.mubr.f32.vlgmr.msra.gmra.mxu0 %v759_v60  ;;  %2210 = vmatprep.subr.mxu0 %v2692_v0 }
  0xd9   : > { %2242 = vmatprep.mubr.msk.f32.mxu0 %vm2693_vm0, %v2692_v0 }
 0x176   : > { %v655_v44 = vpop.f32.mrf.mxu0  ;;  %v755_v45 = vpop.f32.mrf.mxu1 }
 0x177   : > { %v656_v46 = vadd.f32 %v1961_v41, %v655_v44  ;;  %v3038_v47 = vadd.f32 %v1962_v42, %v755_v45 }
 0x178   : > { %v2099_v48 = vpop.f32.mrf.mxu0  ;;  %v2134_v49 = vpop.f32.mrf.mxu1 }
 0x179   : > { %v3041_v51 = vmul.f32 0.17677669, %v656_v46  ;;  %1043 = vrot.lane.b32.xlu1 %v3038_v47, %s2694_s11  ;;  %2171 = vmatpush3.xpose.msk.msra.mxu1 %vm854_vm1, %v3038_v47 }
 0x17a   : > { %2175 = vmatprep.subr.mxu1 %v2692_v0 }
 0x17c   : > { %2173 = vmatmul.mubr.msk.f32.vlgmr.msra.gmra.mxu1 %vm854_vm1, %v3041_v51 }
 0x17d   : > { %1041 = vrot.lane.b32.xlu1 %v3041_v51, %s2694_s11  ;;  %2177 = vmatprep.mubr.msk.f32.mxu1 %vm2693_vm0, %v2692_v0 }
 0x198   : > { %v849_v4 = vpop.f32.mrf.mxu0 }
 0x199   : > { %v3074_v5 = vadd.f32 %v1963_v3, %v849_v4 }
 0x19a   : > { %v2169_v6 = vpop.f32.mrf.mxu0 }
 0x19b   : > { %2176 = vmatpush3.msra.mxu1 %v3074_v5 }
 0x19c   : > { %2180 = vmatprep.subr.mxu1 %v2692_v0 }
 0x1eb   : > { %v1044_v14 = vpop.permute.xlu1 %1043 }
 0x1ef   : > { %v1042_v16 = vpop.permute.xlu1 %1041 }
 0x23c   : > { %v927_v62 = vpop.f32.mrf.mxu1 }
 0x23d   : > { %v933_v63 = vsel %vm932_vm3, %v927_v62, -inf }
 0x23e   : > { %934 = vmax.xlane.f32.xlu0 %v933_v63  ;;  %v2174_v1 = vpop.f32.mrf.mxu1 }
 0x2c7   : > { %v935_v8 = vpop.xlane.xlu0 %934 }
 0x2c8   : > { %v3081_v9 = vmax.f32 %v3078_v7, %v935_v8 }
 0x2ca   : > { %v937_v10 = vsub.f32 %v3078_v7, %v3081_v9  ;;  %1038 = vst.msk [vmem:[#allocation3] sm:$0xff] %vm954_vm4, %v3081_v9  ;;  %942 = vperm.xlu0 %2370, %v3081_v9  }
 0x2cc   : > { %v938_v63 = vmul.f32 1.442695, %v937_v10 }
 0x2ce   : > { %1151 = vrot.lane.b32.xlu0 %v3074_v5, %s2694_s11 }
 0x2cf   : > { %2373 = vset.pattern.permute.xlu0 %v2701_v56 }
 0x2d1   : > { %v3110_v24 = vld [vmem:[#allocation3] sm:$0xff] }
 0x2d2   : > { %1239 = vrot.lane.b32.xlu0 %v3038_v47, %s2697_s15 }
 0x2d6   : > { %1237 = vrot.lane.b32.xlu0 %v3041_v51, %s2697_s15 }
 0x345   : > { %v943_v11 = vpop.permute.xlu0 %942 }
 0x346   : > { %v945_v12 = vsub.f32 %v927_v62, %v943_v11 }
 0x348   : > { %v946_v13 = vmul.f32 1.442695, %v945_v12 }
 0x349   : > { %v1152_v17 = vpop.permute.xlu0 %1151 }
 0x34a   : > { %2383 = vpow2.f32 %v946_v13 }
 0x34d   : > { %v1240_v31 = vpop.permute.xlu0 %1239 }
 0x351   : > { %v1238_v33 = vpop.permute.xlu0 %1237 }
 0x357   : > { %v3094_v15 = vpop.eup %2383 }
 0x358   : > { %2178 = vmatmul.mubr.msk.f32.vlgmr.msra.gmra.mxu1 %vm932_vm3, %v3094_v15  ;;  %v950_v57 = vsel %vm932_vm3, %v3094_v15, 0.0 }
 0x359   : > { %2181 = vmatpush3.xpose.msk.msra.mxu1 %vm854_vm1, %v1044_v14  ;;  %2182 = vmatprep.mubr.msk.f32.mxu1 %vm2693_vm0, %v2692_v0 }
 0x35a   : > { %2185 = vmatprep.subr.mxu1 %v2692_v0 }
 0x35c   : > { %2183 = vmatmul.mubr.msk.f32.vlgmr.msra.gmra.mxu1 %vm854_vm1, %v1042_v16 }
 0x35d   : > { %2186 = vmatpush3.msra.mxu1 %v1152_v17  ;;  %2187 = vmatprep.mubr.msk.f32.mxu1 %vm2693_vm0, %v2692_v0 }
 0x35e   : > { %2190 = vmatprep.subr.mxu1 %v2692_v0 }
 0x418   : > { %v3106_v18 = vpop.f32.mrf.mxu1 }
 0x41a   : > { %v2179_v19 = vpop.f32.mrf.mxu1 }
 0x41c   : > { %v1115_v20 = vpop.f32.mrf.mxu1 }
 0x41d   : > { %v1120_v21 = vsel %vm932_vm3, %v1115_v20, -inf }
 0x41e   : > { %1121 = vmax.xlane.f32.xlu1 %v1120_v21  ;;  %v2184_v22 = vpop.f32.mrf.mxu1 }
 0x4a7   : > { %v1122_v25 = vpop.xlane.xlu1 %1121 }
 0x4a8   : > { %v3113_v26 = vmax.f32 %v3110_v24, %v1122_v25 }
 0x4aa   : > { %v1124_v27 = vsub.f32 %v3110_v24, %v3113_v26  ;;  %1234 = vst.msk [vmem:[#allocation3] sm:$0xff] %vm1141_vm5, %v3113_v26  ;;  %1129 = vperm.xlu1 %2371, %v3113_v26  }
 0x4ac   : > { %v1125_v13 = vmul.f32 1.442695, %v1124_v27 }
 0x4ae   : > { %2372 = vset.pattern.permute.xlu1 %v2699_v39 }
 0x4b1   : > { %v3135_v40 = vld [vmem:[#allocation3] sm:$0xff] }
 0x525   : > { %v1130_v28 = vpop.permute.xlu1 %1129 }
 0x526   : > { %v1132_v29 = vsub.f32 %v1115_v20, %v1130_v28 }
 0x528   : > { %v1133_v30 = vmul.f32 1.442695, %v1132_v29 }
 0x52a   : > { %2385 = vpow2.f32 %v1133_v30 }
 0x537   : > { %v3120_v32 = vpop.eup %2385 }
 0x538   : > { %2188 = vmatmul.mubr.msk.f32.vlgmr.msra.gmra.mxu1 %vm932_vm3, %v3120_v32  ;;  %v1137_v1 = vsel %vm932_vm3, %v3120_v32, 0.0 }
 0x539   : > { %2191 = vmatpush3.xpose.msk.msra.mxu1 %vm854_vm1, %v1240_v31  ;;  %2192 = vmatprep.mubr.msk.f32.mxu1 %vm2693_vm0, %v2692_v0 }
 0x53a   : > { %2195 = vmatprep.subr.mxu1 %v2692_v0 }
 0x53c   : > { %2193 = vmatmul.mubr.msk.f32.vlgmr.msra.gmra.mxu1 %vm854_vm1, %v1238_v33 }
 0x53d   : > { %2197 = vmatprep.mubr.msk.f32.mxu1 %vm2693_vm0, %v2692_v0 }
 0x5f8   : > { %v3131_v34 = vpop.f32.mrf.mxu1 }
 0x5fa   : > { %v2189_v35 = vpop.f32.mrf.mxu1 }
 0x5fc   : > { %v1311_v36 = vpop.f32.mrf.mxu1 }
 0x5fd   : > { %v1316_v37 = vsel %vm932_vm3, %v1311_v36, -inf }
 0x5fe   : > { %1317 = vmax.xlane.f32.xlu0 %v1316_v37  ;;  %v2194_v38 = vpop.f32.mrf.mxu1 }
 0x687   : > { %v1318_v41 = vpop.xlane.xlu0 %1317 }
 0x688   : > { %v3138_v42 = vmax.f32 %v3135_v40, %v1318_v41 }
 0x68a   : > { %v1320_v43 = vsub.f32 %v3135_v40, %v3138_v42  ;;  %1429 = vst.msk [vmem:[#allocation3] sm:$0xff] %vm1337_vm6, %v3138_v42  ;;  %1325 = vperm.xlu1 %2372, %v3138_v42  }
 0x68c   : > { %v1321_v15 = vmul.f32 1.442695, %v1320_v43 }
 0x68e   : > { %1346 = vrot.lane.b32.xlu1 %v3074_v5, %s2697_s15 }
 0x68f   : > { %2375 = vset.pattern.permute.xlu1 %v2698_v23 }
 0x691   : > { %v1510_v58 = vld [vmem:[#allocation3] sm:$0xff] }
 0x692   : > { %1434 = vrot.lane.b32.xlu1 %v3038_v47, %s2700_s12 }
 0x696   : > { %1432 = vrot.lane.b32.xlu1 %v3041_v51, %s2700_s12 }
 0x705   : > { %v1326_v44 = vpop.permute.xlu1 %1325 }
 0x706   : > { %v1328_v45 = vsub.f32 %v1311_v36, %v1326_v44 }
 0x708   : > { %v1329_v46 = vmul.f32 1.442695, %v1328_v45 }
 0x709   : > { %v1347_v48 = vpop.permute.xlu1 %1346 }
 0x70a   : > { %2387 = vpow2.f32 %v1329_v46  ;;  %2196 = vmatpush3.msra.mxu1 %v1347_v48 }
 0x70b   : > { %2200 = vmatprep.subr.mxu1 %v2692_v0  ;;  %2389 = vpow2.f32 %v938_v63  ;;  %v1666_v63 = vld [vmem:[#allocation17 + $0x18] sm:$0xff] }
 0x70d   : > { %v1435_v49 = vpop.permute.xlu1 %1434 }
 0x711   : > { %v1433_v47 = vpop.permute.xlu1 %1432 }
 0x717   : > { %v2388_v50 = vpop.eup %2387 }
 0x718   : > { %2198 = vmatmul.mubr.msk.f32.vlgmr.msra.gmra.mxu1 %vm932_vm3, %v2388_v50  ;;  %v1333_v3 = vsel %vm932_vm3, %v2388_v50, 0.0  ;;  %v2390_v4 = vpop.eup %2389 }
 0x719   : > { %2201 = vmatpush3.xpose.msk.msra.mxu1 %vm854_vm1, %v1435_v49  ;;  %2202 = vmatprep.mubr.msk.f32.mxu1 %vm2693_vm0, %v2692_v0 }
 0x71a   : > { %2205 = vmatprep.subr.mxu1 %v2692_v0 }
 0x71c   : > { %2203 = vmatmul.mubr.msk.f32.vlgmr.msra.gmra.mxu1 %vm854_vm1, %v1433_v47 }
 0x71d   : > { %2207 = vmatprep.mubr.msk.f32.mxu1 %vm2693_vm0, %v2692_v0 }
 0x7d8   : > { %v1418_v51 = vpop.f32.mrf.mxu1 }
 0x7da   : > { %v2199_v52 = vpop.f32.mrf.mxu1 }
 0x7db   : > { %v1678_v52 = vld [vmem:[#allocation17 + $0x78] sm:$0xff] }
 0x7dc   : > { %v1506_v53 = vpop.f32.mrf.mxu1  ;;  %2211 = vmatpush3.msra.mxu0 %v1678_v52 }
 0x7dd   : > { %v1511_v54 = vsel %vm932_vm3, %v1506_v53, -inf  ;;  %2212 = vmatprep.subr.mxu0 %v2692_v0 }
 0x7de   : > { %1512 = vmax.xlane.f32.xlu1 %v1511_v54  ;;  %v2204_v55 = vpop.f32.mrf.mxu1  ;;  %v1676_v54 = vld [vmem:[#allocation17 + $0x68] sm:$0xff] }
 0x7df   : > { %v1675_v55 = vld [vmem:[#allocation17 + $0x60] sm:$0xff] }
 0x7ef   : > { %1541 = vrot.lane.b32.xlu1 %v3074_v5, %s2700_s12  ;;  %v948_v5 = vld [vmem:[#allocation4] sm:$0xff] }
 0x7f0   : > { %v949_v6 = vmul.f32 %v2390_v4, %v948_v5 }
 0x813   : > { %951 = vadd.xlane.f32.xlu1 %v950_v57  ;;  %v1673_v57 = vld [vmem:[#allocation17 + $0x50] sm:$0xff] }
 0x867   : > { %v1513_v59 = vpop.xlane.xlu1 %1512 }
 0x868   : > { %v1514_v60 = vmax.f32 %v1510_v58, %v1513_v59  ;;  %v1670_v59 = vld [vmem:[#allocation17 + $0x38] sm:$0xff] }
 0x86a   : > { %v1515_v61 = vsub.f32 %v1510_v58, %v1514_v60  ;;  %1624 = vst.msk [vmem:[#allocation3] sm:$0xff] %vm1532_vm7, %v1514_v60  ;;  %1520 = vperm.xlu0 %2373, %v1514_v60   ;;  %v1671_v58 = vld [vmem:[#allocation17 + $0x40] sm:$0xff]  ;;  %v1669_v60 = vld [vmem:[#allocation17 + $0x30] sm:$0xff] }
 0x86b   : > { %v1542_v62 = vpop.permute.xlu1 %1541 }
 0x86c   : > { %2206 = vmatpush3.msra.mxu1 %v1542_v62  ;;  %v1516_v16 = vmul.f32 1.442695, %v1515_v61  ;;  %v1668_v61 = vld [vmem:[#allocation17 + $0x28] sm:$0xff]  ;;  %v1667_v62 = vld [vmem:[#allocation17 + $0x20] sm:$0xff] }
 0x86e   : > { %2374 = vset.pattern.permute.xlu0 %v2696_v2 }
 0x889   : > { %1138 = vadd.xlane.f32.xlu0 %v1137_v1  ;;  %v1665_v1 = vld [vmem:[#allocation17 + $0x10] sm:$0xff] }
 0x88d   : > { %1334 = vadd.xlane.f32.xlu0 %v1333_v3  ;;  %v1664_v3 = vld [vmem:[#allocation17 + $0x8] sm:$0xff] }
 0x89c   : > { %v952_v8 = vpop.xlane.xlu1 %951 }
 0x89d   : > { %v953_v11 = vadd.f32 %v952_v8, %v949_v6 }
 0x89f   : > { %955 = vst.msk [vmem:[#allocation4] sm:$0xff] %vm954_vm4, %v953_v11 }
 0x8a3   : > { %959 = vperm.xlu0 %2374, %v2390_v4   ;;  %v1663_v4 = vld [vmem:[#allocation17] sm:$0xff] }
 0x8a6   : > { %v1135_v19 = vld [vmem:[#allocation4] sm:$0xff] }
 0x8a7   : > { %2380 = vset.pattern.permute.xlu0 %v2699_v39 }
 0x8e5   : > { %v1521_v7 = vpop.permute.xlu0 %1520 }
 0x8e6   : > { %v1523_v9 = vsub.f32 %v1506_v53, %v1521_v7  ;;  %v1677_v53 = vld [vmem:[#allocation17 + $0x70] sm:$0xff] }
 0x8e7   : > { %2213 = vmatpush3.msra.mxu0 %v1677_v53 }
 0x8e8   : > { %v1524_v10 = vmul.f32 1.442695, %v1523_v9  ;;  %2214 = vmatprep.subr.mxu0 %v2692_v0 }
 0x8e9   : > { %2215 = vmatpush3.msra.mxu0 %v1676_v54 }
 0x8ea   : > { %2391 = vpow2.f32 %v1524_v10  ;;  %2216 = vmatprep.subr.mxu0 %v2692_v0 }
 0x8eb   : > { %2393 = vpow2.f32 %v1125_v13  ;;  %2217 = vmatpush3.msra.mxu0 %v1675_v55 }
 0x8ec   : > { %2395 = vpow2.f32 %v1321_v15  ;;  %2218 = vmatprep.subr.mxu0 %v2692_v0 }
 0x8ed   : > { %2397 = vpow2.f32 %v1516_v16 }
 0x8f7   : > { %v2392_v12 = vpop.eup %2391 }
 0x8f8   : > { %2208 = vmatmul.mubr.msk.f32.vlgmr.msra.gmra.mxu1 %vm932_vm3, %v2392_v12  ;;  %v1528_v14 = vsel %vm932_vm3, %v2392_v12, 0.0  ;;  %v2394_v17 = vpop.eup %2393 }
 0x8f9   : > { %1529 = vadd.xlane.f32.xlu1 %v1528_v14  ;;  %v2396_v20 = vpop.eup %2395  ;;  %v1136_v21 = vmul.f32 %v2394_v17, %v1135_v19 }
 0x8fa   : > { %v2398_v25 = vpop.eup %2397 }
 0x90a   : > { %1146 = vperm.xlu1 %2375, %v2394_v17  }
 0x90e   : > { %1228 = vrot.lane.b32.xlu1 %v3131_v34, %s2700_s12 }
 0x90f   : > { %2376 = vset.pattern.permute.xlu1 %v2699_v39 }
 0x912   : > { %1342 = vperm.xlu1 %2376, %v2396_v20   ;;  %v1139_v22 = vpop.xlane.xlu0 %1138 }
 0x913   : > { %v1140_v24 = vadd.f32 %v1139_v22, %v1136_v21 }
 0x915   : > { %1142 = vst.msk [vmem:[#allocation4] sm:$0xff] %vm1141_vm5, %v1140_v24  ;;  %v1976_v24 = vld [vmem:[%s3338_s25] ss:$0 sm:$0xff] }
 0x916   : > { %1423 = vrot.lane.b32.xlu1 %v1418_v51, %s2697_s15  ;;  %v1335_v26 = vpop.xlane.xlu0 %1334 }
 0x917   : > { %2377 = vset.pattern.permute.xlu1 %v2701_v56 }
 0x91a   : > { %1537 = vperm.xlu1 %2377, %v2398_v25  }
 0x91c   : > { %v1331_v27 = vld [vmem:[#allocation4] sm:$0xff] }
 0x91d   : > { %v1332_v28 = vmul.f32 %v2396_v20, %v1331_v27 }
 0x91e   : > { %v960_v29 = vpop.permute.xlu0 %959  ;;  %2378 = vset.pattern.permute.xlu1 %v2696_v2 }
 0x91f   : > { %v1336_v30 = vadd.f32 %v1335_v26, %v1332_v28  ;;  %v962_v31 = vmul.f32 0.0, %v960_v29 }
 0x921   : > { %1338 = vst.msk [vmem:[#allocation4] sm:$0xff] %vm1337_vm6, %v1336_v30  ;;  %v1036_v32 = vadd.f32 %v3106_v18, %v962_v31 }
 0x923   : > { %1037 = vst.msk [vmem:[#allocation5] sm:$0xff] %vm854_vm1, %v1036_v32 }
 0x928   : > { %v1526_v33 = vld [vmem:[#allocation4] sm:$0xff] }
 0x929   : > { %v1527_v34 = vmul.f32 %v2398_v25, %v1526_v33 }
 0x92a   : > { %v1143_v38 = vld [vmem:[#allocation5] sm:$0xff] }
 0x982   : > { %v1530_v35 = vpop.xlane.xlu1 %1529 }
 0x983   : > { %v1531_v36 = vadd.f32 %v1530_v35, %v1527_v34 }
 0x985   : > { %1533 = vst.msk [vmem:[#allocation4] sm:$0xff] %vm1532_vm7, %v1531_v36 }
 0x986   : > { %v1147_v37 = vpop.permute.xlu1 %1146 }
 0x987   : > { %v1149_v39 = vmul.f32 %v1147_v37, %v1143_v38 }
 0x98a   : > { %v1229_v40 = vpop.permute.xlu1 %1228 }
 0x98b   : > { %v1231_v2 = vadd.f32 %v1229_v40, %v1149_v39 }
 0x98c   : > { %v1628_v41 = vld [vmem:[#allocation4] sm:$0xff] }
 0x98d   : > { %1233 = vst.msk [vmem:[#allocation5] sm:$0xff] %vm1232_vm8, %v1231_v2  ;;  %2399 = vrcp.f32 %v1628_v41 }
 0x98e   : > { %v1343_v42 = vpop.permute.xlu1 %1342 }
 0x992   : > { %v1424_v44 = vpop.permute.xlu1 %1423 }
 0x994   : > { %v1339_v18 = vld [vmem:[#allocation5] sm:$0xff] }
 0x995   : > { %v1345_v43 = vmul.f32 %v1343_v42, %v1339_v18 }
 0x996   : > { %v1538_v6 = vpop.permute.xlu1 %1537 }
 0x997   : > { %v1426_v45 = vadd.f32 %v1424_v44, %v1345_v43 }
 0x999   : > { %1428 = vst.msk [vmem:[#allocation5] sm:$0xff] %vm1427_vm9, %v1426_v45 }
 0x99a   : > { %v2400_v46 = vpop.eup %2399 }
 0x99b   : > { %v1630_v48 = vmul.f32 %v2400_v46, %v1628_v41 }
 0x99d   : > { %v1631_v49 = vsub.f32 2.0, %v1630_v48 }
 0x99f   : > { %v1632_v50 = vmul.f32 %v2400_v46, %v1631_v49 }
 0x9a0   : > { %v1534_v5 = vld [vmem:[#allocation5] sm:$0xff] }
 0x9a1   : > { %1650 = vperm.xlu0 %2380, %v1632_v50   ;;  %v1540_v8 = vmul.f32 %v1538_v6, %v1534_v5 }
 0x9a5   : > { %2382 = vset.pattern.permute.xlu0 %v2701_v56 }
 0x9b8   : > { %v1613_v47 = vpop.f32.mrf.mxu1 }
 0x9b9   : > { %1618 = vrot.lane.b32.xlu1 %v1613_v47, %s2694_s11 }
 0x9ba   : > { %v2209_v51 = vpop.f32.mrf.mxu1 }
 0x9bd   : > { %1636 = vperm.xlu1 %2378, %v1632_v50  }
 0x9c1   : > { %2379 = vset.pattern.permute.xlu1 %v2698_v23  ;;  %v1674_v23 = vld [vmem:[#allocation17 + $0x58] sm:$0xff] }
 0x9c2   : > { %1643 = vperm.xlu1 %2379, %v1632_v50   ;;  %2219 = vmatpush3.msra.mxu0 %v1674_v23 }
 0x9c3   : > { %2220 = vmatprep.subr.mxu0 %v2692_v0 }
 0x9c4   : > { %2221 = vmatpush3.msra.mxu0 %v1673_v57 }
 0x9c5   : > { %2222 = vmatprep.subr.mxu0 %v2692_v0 }
 0x9c6   : > { %2381 = vset.pattern.permute.xlu1 %v2701_v56  ;;  %v1672_v56 = vld [vmem:[#allocation17 + $0x48] sm:$0xff] }
 0x9c7   : > { %1657 = vperm.xlu1 %2381, %v1632_v50   ;;  %2223 = vmatpush3.msra.mxu0 %v1672_v56 }
 0x9c8   : > { %2224 = vmatprep.subr.mxu0 %v2692_v0 }
 0x9c9   : > { %2225 = vmatpush3.msra.mxu0 %v1671_v58 }
 0x9ca   : > { %2226 = vmatprep.subr.mxu0 %v2692_v0 }
 0x9cb   : > { %2227 = vmatpush3.msra.mxu0 %v1670_v59 }
 0x9cc   : > { %2228 = vmatprep.subr.mxu0 %v2692_v0 }
 0x9cd   : > { %2229 = vmatpush3.msra.mxu0 %v1669_v60 }
 0x9ce   : > { %2230 = vmatprep.subr.mxu0 %v2692_v0 }
 0x9cf   : > { %2231 = vmatpush3.msra.mxu0 %v1668_v61 }
 0x9d0   : > { %2232 = vmatprep.subr.mxu0 %v2692_v0 }
 0x9d1   : > { %2233 = vmatpush3.msra.mxu0 %v1667_v62 }
 0x9d2   : > { %2234 = vmatprep.subr.mxu0 %v2692_v0 }
 0x9d3   : > { %2235 = vmatpush3.msra.mxu0 %v1666_v63 }
 0x9d4   : > { %2236 = vmatprep.subr.mxu0 %v2692_v0 }
 0x9d5   : > { %2237 = vmatpush3.msra.mxu0 %v1665_v1 }
 0x9d6   : > { %2238 = vmatprep.subr.mxu0 %v2692_v0 }
 0x9d7   : > { %2239 = vmatpush3.msra.mxu0 %v1664_v3 }
 0x9d8   : > { %2240 = vmatprep.subr.mxu0 %v2692_v0 }
 0x9d9   : > { %2241 = vmatpush3.msra.mxu0 %v1663_v4 }
 0xa1c   : > { %v1651_v0 = vpop.permute.xlu0 %1650 }
 0xa2b   : > { %v1619_v11 = vpop.permute.xlu1 %1618 }
 0xa2c   : > { %v1621_v7 = vadd.f32 %v1619_v11, %v1540_v8 }
 0xa2e   : > { %1623 = vst.msk [vmem:[#allocation5] sm:$0xff] %vm1622_vm10, %v1621_v7 }
 0xa35   : > { %v1633_v9 = vld [vmem:[#allocation5] sm:$0xff] }
 0xa38   : > { %v1637_v10 = vpop.permute.xlu1 %1636 }
 0xa39   : > { %v1639_v12 = vmul.f32 %v1637_v10, %v1633_v9 }
 0xa3b   : > { %1640 = vst.msk [vmem:[#allocation5] sm:$0xff] %vm854_vm1, %v1639_v12 }
 0xa3d   : > { %v1644_v14 = vpop.permute.xlu1 %1643 }
 0xa42   : > { %v1641_v13 = vld [vmem:[#allocation5] sm:$0xff]  ;;  %v1658_v20 = vpop.permute.xlu1 %1657 }
 0xa43   : > { %v1646_v15 = vmul.f32 %v1644_v14, %v1641_v13 }
 0xa45   : > { %1647 = vst.msk [vmem:[#allocation5] sm:$0xff] %vm1232_vm8, %v1646_v15 }
 0xa4c   : > { %v1648_v16 = vld [vmem:[#allocation5] sm:$0xff] }
 0xa4d   : > { %v1653_v17 = vmul.f32 %v1651_v0, %v1648_v16 }
 0xa4f   : > { %1654 = vst.msk [vmem:[#allocation5] sm:$0xff] %vm1427_vm9, %v1653_v17 }
 0xa56   : > { %v1655_v19 = vld [vmem:[#allocation5] sm:$0xff] }
 0xa57   : > { %v1660_v21 = vmul.f32 %v1658_v20, %v1655_v19 }
 0xa59   : > { %1661 = vst.msk [vmem:[#allocation5] sm:$0xff] %vm1622_vm10, %v1660_v21 }
 0xa60   : > { %v1662_v22 = vld [vmem:[#allocation5] sm:$0xff] }
 0xa61   : > { %2243 = vmatmul.mubr.f32.vlgmr.msra.gmra.mxu0 %v1662_v22 }
 0xb21   : > { %v1752_v25 = vpop.f32.mrf.mxu0 }
 0xb22   : > { %v1753_v26 = vadd.f32 %v1976_v24, %v1752_v25 }
 0xb23   : > { %v2244_v27 = vpop.f32.mrf.mxu0 }
 0xb24   : > { %1756 = vst [vmem:[%s560_s5] sm:$0xff] %v1753_v26 }
 0xb25   : > { %2602 = shalt.err (!%p2599_p4)
}
 0xb26   : > { %s2603_s11 = scalar_lea.hbm %s3230_s23, 128  ;;  %s2607_s10 = scalar_lea.hbm %s3340_s24, 256 }
 0xb27   : > { %p2604_p8 = scmp.ne.s32.totalorder %s3230_s23, %s2603_s11  ;;  %p2608_p0 = scmp.lt.s32.totalorder %s3230_s23, %s3340_s24 }
 0xb28   : > { %p2609_p13 = scmp.lt.s32.totalorder %s2607_s10, %s2603_s11 }
 0xb29   : > { %p2605_p6 = pnand %p2604_p8, %p3341_p12 }
 0xb2a   : > { %p2610_p9 = por %p2609_p13, %p2608_p0 }
 0xb2b   : > { %p2606_p3 = pneg %p2605_p6 }
 0xb2d   : > { %p2611_p11 = pnand %p2610_p9, %p2606_p3 }
 0xb2f   : > { %2614 = shalt.err (!%p2611_p11)
}
 0xb30   : > { %2267 = dma.vmem_to_hbm [thread:$0]  (%p3341_p12), %s1773_s28, 128, %s3230_s23, %s1758_s16  }
 0xb31 PF: > { %s3342_s22 = sld [smem:[#allocation24_spill]] }
 0xb32   : > { %s3343_s27 = sld [smem:[#allocation30_spill]] }
 0xb33   : > { %s3344_s25 = sld [smem:[#allocation26_spill]] }
 0xb37   : > { %s1784_s29 = sand.u32 1, %s3342_s22  }
 0xb38   : > { %p3345_p2 = scmp.ne.s32.totalorder %s3343_s27, 0  ;;  %s1785_s5 = scalar_lea.sflag [#allocation8], %s1784_s29 }
 0xb39   : > { %p3346_p5 = scmp.ge.s32.totalorder %s3344_s25, 2 }
 0xb3b   : > { %p2293_p10 = pnand %p3346_p5, %p3345_p2 }
 0xb3d   : > { %p2294_p1 = pneg %p2293_p10 }
 0xb3f   : > { %2656 = dma.done.wait (%p2294_p1), %s1785_s5, 128  }
 0xb40   : > { %2658 = vsyncadd (%p2294_p1), %s1785_s5, 4294967168  ;;  %s32_s22 = sadd.s32 1, %s3344_s25   ;;  %s3347_s30 = sld [smem:[#allocation29_spill]] }
 0xb41   : > { %p29_p7 = scmp.ge.s32.totalorder %s32_s22, 4   ;;  %s3348_s20 = sld [smem:[#allocation25_spill]] }
 0xb42   : > { %s3349_s21 = sld [smem:[#allocation27_spill]]  ;;  %s3350_s17 = smov %s2665_s18 }
 0xb43   : > { %s3351_s18 = smov %s2669_s19  ;;  %31 = sbr.rel (!%p29_p7) target bundleno = 17 (0x11), region = 157 }
 0xb46   : > { %s3352_s19 = smov %s3347_s30 }
 0xb48   :  { %1790 = vsyncpa [#allocation7], 1 }
 0xb49   :  { %1792 = vsyncpa [#allocation7 + $0x1], 1 }
 0xb4a   :  { %1793 = vsyncpa [#allocation10], 1 }
 0xb4b   :  { %1795 = vsyncpa [#allocation10 + $0x1], 1 }
 0xb4c   :  { %1796 = vsyncpa [#allocation13], 1 }
 0xb4d   :  { %1797 = vsyncpa [#allocation16], 1 }
 0xb4e   :  { %1798 = vsyncpa [#allocation8], 1 }
 0xb4f   :  { %1800 = vsyncpa [#allocation8 + $0x1], 1 }

</bundles_post_ra>
